<compile_context>
chip_gen: v7x
topology: tpu7x:2x2x1
jax: 0.10.0
libtpu: 0.0.40
codegen_flags: <defaults>
</compile_context>

<pallas_src>
import jax
import jax.numpy as jnp
from jax.experimental import pallas as pl
from jax.experimental.pallas import tpu as pltpu

# ----------------------------- configuration --------------------------------
B, C, IMG, PATCH = 2, 3, 16, 8
NP = (IMG // PATCH) ** 2          # number of patch tokens = 4
D = 32                            # embed_dim
HEADS, HD = 2, 16                 # heads, head dim
DEPTH = 2                         # transformer blocks
MLP = 4 * D                       # mlp hidden = 128
NB_CLASSES = 10
NB_PAD = 128                      # lane-dense padded logits / head width
EPS = 1e-5                        # F.layer_norm / nn.LayerNorm default eps
CPP = C * PATCH * PATCH           # im2col width = 192
BN = B * NP                       # total tokens = 8

# rows of the per-block packed vector slab (DEPTH, 8, 128):
#   0: ln1_g  1: ln1_b  2: ln2_g  3: ln2_b
#   4: b_proj 5: b_fc2  6: b_qkv (3D wide, q-part pre-scaled)  7: b_fc1 (MLP wide)


# ------------------------------ fused kernel ---------------------------------
def _ln(x, g, b):
    """Affine layernorm over the last dim (eps matches nn.LayerNorm default)."""
    mu = jnp.mean(x, axis=-1, keepdims=True)
    var = jnp.mean((x - mu) ** 2, axis=-1, keepdims=True)
    return (x - mu) * jax.lax.rsqrt(var + EPS) * g + b


def _fused_forward_kernel(xp_ref, posb_ref, patchw_ref,
                          wqkv_ref, wproj_ref, wfc1_ref, wfc2_ref,
                          vecs_ref, tail_ref, headw_ref, out_ref):
    # ---- patch embed (Conv2d stride=PATCH as im2col matmul) + bias + pos ----
    x = jnp.dot(xp_ref[...], patchw_ref[...],
                preferred_element_type=jnp.float32) + posb_ref[...]      # (BN, D)

    # ---- transformer blocks, statically unrolled; everything stays in VMEM --
    for blk in range(DEPTH):
        vec = vecs_ref[blk]                                              # (8, 128)
        ln1_g, ln1_b = vec[0:1, :D], vec[1:2, :D]
        ln2_g, ln2_b = vec[2:3, :D], vec[3:4, :D]
        b_proj, b_fc2 = vec[4:5, :D], vec[5:6, :D]
        b_qkv = vec[6:7, :3 * D]
        b_fc1 = vec[7:8, :MLP]

        # --- attention branch (pre-norm); drop_path -> identity in eval ---
        h = _ln(x, ln1_g, ln1_b)
        # q-part of W_qkv / b_qkv is pre-scaled by 1/sqrt(HD) at packing time,
        # so the score matmul below needs no extra multiply.
        qkv = jnp.dot(h, wqkv_ref[blk],
                      preferred_element_type=jnp.float32) + b_qkv        # (BN, 3D)

        batch_rows = []
        for bi in range(B):
            tok = slice(bi * NP, (bi + 1) * NP)
            head_outs = []
            for hh in range(HEADS):
                q = qkv[tok, hh * HD:(hh + 1) * HD]                      # (NP, HD)
                k = qkv[tok, D + hh * HD:D + (hh + 1) * HD]              # (NP, HD)
                v = qkv[tok, 2 * D + hh * HD:2 * D + (hh + 1) * HD]      # (NP, HD)
                # contract last dims directly: no explicit k transpose.
                s = jax.lax.dot_general(
                    q, k, (((1,), (1,)), ((), ())),
                    preferred_element_type=jnp.float32)                  # (NP, NP)
                s = s - jnp.max(s, axis=-1, keepdims=True)
                p = jnp.exp(s)
                p = p * pl.reciprocal(jnp.sum(p, axis=-1, keepdims=True),
                                      approx=True)
                head_outs.append(jnp.dot(p, v,
                                         preferred_element_type=jnp.float32))
            batch_rows.append(jnp.concatenate(head_outs, axis=-1))       # (NP, D)
        ao = jnp.concatenate(batch_rows, axis=0)                         # (BN, D)

        ao = jnp.dot(ao, wproj_ref[blk],
                     preferred_element_type=jnp.float32) + b_proj
        x = x + ao                                                       # residual

        # --- mlp branch ---
        h = _ln(x, ln2_g, ln2_b)
        h = jnp.dot(h, wfc1_ref[blk],
                    preferred_element_type=jnp.float32) + b_fc1          # (BN, MLP)
        # TODO(synk): PyTorch nn.GELU default is exact (erf); tanh approximation used here.
        h = jax.nn.gelu(h, approximate=True)
        h = jnp.dot(h, wfc2_ref[blk],
                    preferred_element_type=jnp.float32) + b_fc2
        x = x + h                                                        # residual

    # ---- pretrained_model.norm (affine layernorm) ----
    norm_g = tail_ref[0:1, :D]
    norm_b = tail_ref[1:2, :D]
    head_b = tail_ref[2:3, :]                                            # (1, NB_PAD)
    x = _ln(x, norm_g, norm_b)

    # ---- FinetuningModel head: mean over tokens -> squeeze(1) (no-op) ->
    #      F.layer_norm (no affine) -> head_drop (identity) -> mlp_head ----
    pooled = jnp.concatenate(
        [jnp.mean(x[bi * NP:(bi + 1) * NP, :], axis=0, keepdims=True)
         for bi in range(B)], axis=0)                                    # (B, D)
    mu = jnp.mean(pooled, axis=-1, keepdims=True)
    var = jnp.mean((pooled - mu) ** 2, axis=-1, keepdims=True)
    pooled = (pooled - mu) * jax.lax.rsqrt(var + EPS)

    # lane-dense (B, 128) store; wrapper slices back to NB_CLASSES.
    out_ref[...] = (jnp.dot(pooled, headw_ref[...],
                            preferred_element_type=jnp.float32)
                    + head_b).astype(out_ref.dtype)


# ------------------------------ wrapper ---------------------------------------
def _full_spec(shape):
    n = len(shape)
    return pl.BlockSpec(shape, lambda i, _n=n: (0,) * _n)


def finetuning_model_forward(params, x):
    """FinetuningModel.forward (eval mode): dropout / drop_path are identity."""
    b, c, hgt, wdt = x.shape
    gh, gw = hgt // PATCH, wdt // PATCH
    # im2col for Conv2d(C, D, PATCH, stride=PATCH): pure layout plumbing.
    xp = x.reshape(b, c, gh, PATCH, gw, PATCH)
    xp = xp.transpose(0, 2, 4, 1, 3, 5).reshape(b * gh * gw, CPP)

    logits_pad = pl.pallas_call(
        _fused_forward_kernel,
        grid=(1,),
        out_shape=jax.ShapeDtypeStruct((B, NB_PAD), jnp.float32),
        in_specs=[
            _full_spec((BN, CPP)),            # im2col patches
            _full_spec((BN, D)),              # pos embed + patch bias (pre-added)
            _full_spec((CPP, D)),             # patch-embed weight
            _full_spec((DEPTH, D, 3 * D)),    # qkv weights (q-part pre-scaled)
            _full_spec((DEPTH, D, D)),        # proj weights
            _full_spec((DEPTH, D, MLP)),      # fc1 weights
            _full_spec((DEPTH, MLP, D)),      # fc2 weights
            _full_spec((DEPTH, 8, 128)),      # per-block vector slab (LN g/b, biases)
            _full_spec((3, NB_PAD)),          # final norm g/b + padded head bias
            _full_spec((D, NB_PAD)),          # padded head weight
        ],
        out_specs=_full_spec((B, NB_PAD)),
        compiler_params=pltpu.CompilerParams(
            dimension_semantics=("arbitrary",)),
    )(xp, params["posb"], params["patch_w"],
      params["w_qkv"], params["w_proj"], params["w_fc1"], params["w_fc2"],
      params["vecs"], params["tail"], params["head_w_pad"])

    return logits_pad[:, :NB_CLASSES]


# --------------------------- synthetic pretrained ViT -------------------------
def init_params(key):
    ks = iter(jax.random.split(key, 64))
    scale = 1.0 / (HD ** 0.5)

    patch_w = 0.02 * jax.random.normal(next(ks), (CPP, D), jnp.float32)
    patch_b = 0.02 * jax.random.normal(next(ks), (1, D), jnp.float32)
    pos_embed = 0.02 * jax.random.normal(next(ks), (NP, D), jnp.float32)

    w_qkv, w_proj, w_fc1, w_fc2, vecs = [], [], [], [], []
    for _ in range(DEPTH):
        wq = 0.02 * jax.random.normal(next(ks), (D, 3 * D), jnp.float32)
        # fold the attention scale 1/sqrt(HD) into the Q third of W_qkv / b_qkv
        wq = wq.at[:, :D].multiply(scale)
        w_qkv.append(wq)
        w_proj.append(0.02 * jax.random.normal(next(ks), (D, D), jnp.float32))
        w_fc1.append(0.02 * jax.random.normal(next(ks), (D, MLP), jnp.float32))
        w_fc2.append(0.02 * jax.random.normal(next(ks), (MLP, D), jnp.float32))
        # per-block vector slab, lane-padded to 128
        b_qkv = 0.02 * jax.random.normal(next(ks), (3 * D,))
        b_qkv = b_qkv.at[:D].multiply(scale)                             # q bias scaled
        v = jnp.zeros((8, 128), jnp.float32)
        v = v.at[0, :D].set(1.0 + 0.02 * jax.random.normal(next(ks), (D,)))  # ln1_g
        v = v.at[1, :D].set(0.02 * jax.random.normal(next(ks), (D,)))        # ln1_b
        v = v.at[2, :D].set(1.0 + 0.02 * jax.random.normal(next(ks), (D,)))  # ln2_g
        v = v.at[3, :D].set(0.02 * jax.random.normal(next(ks), (D,)))        # ln2_b
        v = v.at[4, :D].set(0.02 * jax.random.normal(next(ks), (D,)))        # b_proj
        v = v.at[5, :D].set(0.02 * jax.random.normal(next(ks), (D,)))        # b_fc2
        v = v.at[6, :3 * D].set(b_qkv)                                        # b_qkv
        v = v.at[7, :MLP].set(0.02 * jax.random.normal(next(ks), (MLP,)))     # b_fc1
        vecs.append(v)

    norm_g = jnp.ones((D,), jnp.float32)
    norm_b = jnp.zeros((D,), jnp.float32)
    head_w = 0.02 * jax.random.normal(next(ks), (D, NB_CLASSES), jnp.float32)
    head_b = 0.02 * jax.random.normal(next(ks), (NB_CLASSES,), jnp.float32)

    # ---- pack into the fused-kernel layout (few, lane-dense slabs) ----
    posb = jnp.tile(pos_embed, (B, 1)) + patch_b                 # (BN, D)
    tail = jnp.zeros((3, NB_PAD), jnp.float32)
    tail = tail.at[0, :D].set(norm_g)
    tail = tail.at[1, :D].set(norm_b)
    tail = tail.at[2, :NB_CLASSES].set(head_b)
    head_w_pad = jnp.zeros((D, NB_PAD), jnp.float32).at[:, :NB_CLASSES].set(head_w)

    return {
        "posb": posb,
        "patch_w": patch_w,
        "w_qkv": jnp.stack(w_qkv),
        "w_proj": jnp.stack(w_proj),
        "w_fc1": jnp.stack(w_fc1),
        "w_fc2": jnp.stack(w_fc2),
        "vecs": jnp.stack(vecs),
        "tail": tail,
        "head_w_pad": head_w_pad,
    }


# ----------------------------------- main -------------------------------------
if __name__ == "__main__":
    key = jax.random.PRNGKey(0)
    pkey, xkey = jax.random.split(key)
    params = init_params(pkey)
    x = jax.random.normal(xkey, (B, C, IMG, IMG), jnp.float32)   # NCHW like PyTorch

    out = jax.jit(finetuning_model_forward)(params, x)
    out = jax.block_until_ready(out)
    assert out.shape == (B, NB_CLASSES), out.shape
    print("KERNEL_OK")
</pallas_src>

<mosaic_0001>
module attributes {stable_mosaic.version = 11 : i64} {
  func.func @_fused_forward_kernel(%arg0: i32, %arg1: memref<8x192xf32, #tpu.memory_space<vmem>>, %arg2: memref<8x32xf32, #tpu.memory_space<vmem>>, %arg3: memref<192x32xf32, #tpu.memory_space<vmem>>, %arg4: memref<2x32x96xf32, #tpu.memory_space<vmem>>, %arg5: memref<2x32x32xf32, #tpu.memory_space<vmem>>, %arg6: memref<2x32x128xf32, #tpu.memory_space<vmem>>, %arg7: memref<2x128x32xf32, #tpu.memory_space<vmem>>, %arg8: memref<2x8x128xf32, #tpu.memory_space<vmem>>, %arg9: memref<3x128xf32, #tpu.memory_space<vmem>>, %arg10: memref<32x128xf32, #tpu.memory_space<vmem>>, %arg11: memref<2x128xf32, #tpu.memory_space<vmem>>) attributes {dimension_semantics = [#tpu.dimension_semantics<arbitrary>], iteration_bounds = array<i64: 1>, scalar_prefetch = 0 : i64, scratch_operands = 0 : i64, tpu.core_type = #tpu.core_type<tc>, window_params = [{pipeline_mode = #tpu.pipeline_mode<synchronous>, transform_indices = @transform_0, window_bounds = array<i64: 8, 192>}, {pipeline_mode = #tpu.pipeline_mode<synchronous>, transform_indices = @transform_1, window_bounds = array<i64: 8, 32>}, {pipeline_mode = #tpu.pipeline_mode<synchronous>, transform_indices = @transform_2, window_bounds = array<i64: 192, 32>}, {pipeline_mode = #tpu.pipeline_mode<synchronous>, transform_indices = @transform_3, window_bounds = array<i64: 2, 32, 96>}, {pipeline_mode = #tpu.pipeline_mode<synchronous>, transform_indices = @transform_4, window_bounds = array<i64: 2, 32, 32>}, {pipeline_mode = #tpu.pipeline_mode<synchronous>, transform_indices = @transform_5, window_bounds = array<i64: 2, 32, 128>}, {pipeline_mode = #tpu.pipeline_mode<synchronous>, transform_indices = @transform_6, window_bounds = array<i64: 2, 128, 32>}, {pipeline_mode = #tpu.pipeline_mode<synchronous>, transform_indices = @transform_7, window_bounds = array<i64: 2, 8, 128>}, {pipeline_mode = #tpu.pipeline_mode<synchronous>, transform_indices = @transform_8, window_bounds = array<i64: 3, 128>}, {pipeline_mode = #tpu.pipeline_mode<synchronous>, transform_indices = @transform_9, window_bounds = array<i64: 32, 128>}, {pipeline_mode = #tpu.pipeline_mode<synchronous>, transform_indices = @transform_10, window_bounds = array<i64: 2, 128>}]} {
    %c0 = arith.constant 0 : index
    %c0_0 = arith.constant 0 : index
    %0 = vector.load %arg1[%c0, %c0_0] : memref<8x192xf32, #tpu.memory_space<vmem>>, vector<8x192xf32>
    %c0_1 = arith.constant 0 : index
    %c0_2 = arith.constant 0 : index
    %1 = vector.load %arg3[%c0_1, %c0_2] : memref<192x32xf32, #tpu.memory_space<vmem>>, vector<192x32xf32>
    %cst = arith.constant dense<0.000000e+00> : vector<8x32xf32>
    %2 = tpu.matmul %0, %1, %cst {dimension_numbers = #tpu.dot_dimension_numbers<[1], [0], [0], [1], [0, 0, 1, 1], [], []>} : vector<8x192xf32>, vector<192x32xf32>, vector<8x32xf32> -> vector<8x32xf32>
    %c0_3 = arith.constant 0 : index
    %c0_4 = arith.constant 0 : index
    %3 = vector.load %arg2[%c0_3, %c0_4] : memref<8x32xf32, #tpu.memory_space<vmem>>, vector<8x32xf32>
    %4 = arith.addf %2, %3 : vector<8x32xf32>
    %c0_5 = arith.constant 0 : index
    %c0_6 = arith.constant 0 : index
    %c0_7 = arith.constant 0 : index
    %5 = vector.load %arg8[%c0_5, %c0_6, %c0_7] : memref<2x8x128xf32, #tpu.memory_space<vmem>>, vector<1x8x128xf32>
    %6 = vector.shape_cast %5 : vector<1x8x128xf32> to vector<8x128xf32>
    %7 = vector.extract_strided_slice %6 {offsets = [0, 0], sizes = [1, 32], strides = [1, 1]} : vector<8x128xf32> to vector<1x32xf32>
    %8 = vector.extract_strided_slice %6 {offsets = [1, 0], sizes = [1, 32], strides = [1, 1]} : vector<8x128xf32> to vector<1x32xf32>
    %9 = vector.extract_strided_slice %6 {offsets = [2, 0], sizes = [1, 32], strides = [1, 1]} : vector<8x128xf32> to vector<1x32xf32>
    %10 = vector.extract_strided_slice %6 {offsets = [3, 0], sizes = [1, 32], strides = [1, 1]} : vector<8x128xf32> to vector<1x32xf32>
    %11 = vector.extract_strided_slice %6 {offsets = [4, 0], sizes = [1, 32], strides = [1, 1]} : vector<8x128xf32> to vector<1x32xf32>
    %12 = vector.extract_strided_slice %6 {offsets = [5, 0], sizes = [1, 32], strides = [1, 1]} : vector<8x128xf32> to vector<1x32xf32>
    %13 = vector.extract_strided_slice %6 {offsets = [6, 0], sizes = [1, 96], strides = [1, 1]} : vector<8x128xf32> to vector<1x96xf32>
    %14 = vector.extract_strided_slice %6 {offsets = [7, 0], sizes = [1, 128], strides = [1, 1]} : vector<8x128xf32> to vector<1x128xf32>
    %cst_8 = arith.constant dense<0.000000e+00> : vector<8xf32>
    %15 = vector.multi_reduction <add>, %4, %cst_8 [1] : vector<8x32xf32> to vector<8xf32>
    %16 = vector.shape_cast %15 : vector<8xf32> to vector<8x1xf32>
    %cst_9 = arith.constant 3.200000e+01 : f32
    %17 = vector.broadcast %cst_9 : f32 to vector<8x1xf32>
    %18 = arith.divf %16, %17 : vector<8x1xf32>
    %19 = vector.broadcast %18 : vector<8x1xf32> to vector<8x32xf32>
    %20 = arith.subf %4, %19 : vector<8x32xf32>
    %21 = arith.mulf %20, %20 : vector<8x32xf32>
    %cst_10 = arith.constant dense<0.000000e+00> : vector<8xf32>
    %22 = vector.multi_reduction <add>, %21, %cst_10 [1] : vector<8x32xf32> to vector<8xf32>
    %23 = vector.shape_cast %22 : vector<8xf32> to vector<8x1xf32>
    %cst_11 = arith.constant 3.200000e+01 : f32
    %24 = vector.broadcast %cst_11 : f32 to vector<8x1xf32>
    %25 = arith.divf %23, %24 : vector<8x1xf32>
    %26 = vector.broadcast %18 : vector<8x1xf32> to vector<8x32xf32>
    %27 = arith.subf %4, %26 : vector<8x32xf32>
    %cst_12 = arith.constant 9.99999974E-6 : f32
    %28 = vector.broadcast %cst_12 : f32 to vector<8x1xf32>
    %29 = arith.addf %25, %28 : vector<8x1xf32>
    %30 = math.rsqrt %29 : vector<8x1xf32>
    %31 = vector.broadcast %30 : vector<8x1xf32> to vector<8x32xf32>
    %32 = arith.mulf %27, %31 : vector<8x32xf32>
    %33 = vector.broadcast %7 : vector<1x32xf32> to vector<8x32xf32>
    %34 = arith.mulf %32, %33 : vector<8x32xf32>
    %35 = vector.broadcast %8 : vector<1x32xf32> to vector<8x32xf32>
    %36 = arith.addf %34, %35 : vector<8x32xf32>
    %c0_13 = arith.constant 0 : index
    %c0_14 = arith.constant 0 : index
    %c0_15 = arith.constant 0 : index
    %37 = vector.load %arg4[%c0_13, %c0_14, %c0_15] : memref<2x32x96xf32, #tpu.memory_space<vmem>>, vector<1x32x96xf32>
    %38 = vector.shape_cast %37 : vector<1x32x96xf32> to vector<32x96xf32>
    %cst_16 = arith.constant dense<0.000000e+00> : vector<8x96xf32>
    %39 = tpu.matmul %36, %38, %cst_16 {dimension_numbers = #tpu.dot_dimension_numbers<[1], [0], [0], [1], [0, 0, 1, 1], [], []>} : vector<8x32xf32>, vector<32x96xf32>, vector<8x96xf32> -> vector<8x96xf32>
    %40 = vector.broadcast %13 : vector<1x96xf32> to vector<8x96xf32>
    %41 = arith.addf %39, %40 : vector<8x96xf32>
    %42 = vector.extract_strided_slice %41 {offsets = [0, 0], sizes = [4, 16], strides = [1, 1]} : vector<8x96xf32> to vector<4x16xf32>
    %43 = vector.extract_strided_slice %41 {offsets = [0, 32], sizes = [4, 16], strides = [1, 1]} : vector<8x96xf32> to vector<4x16xf32>
    %44 = vector.extract_strided_slice %41 {offsets = [0, 64], sizes = [4, 16], strides = [1, 1]} : vector<8x96xf32> to vector<4x16xf32>
    %cst_17 = arith.constant dense<0.000000e+00> : vector<4x4xf32>
    %45 = tpu.matmul %42, %43, %cst_17 {dimension_numbers = #tpu.dot_dimension_numbers<[1], [1], [0], [0], [0, 0, 1, 0], [], []>} : vector<4x16xf32>, vector<4x16xf32>, vector<4x4xf32> -> vector<4x4xf32>
    %cst_18 = arith.constant dense<0xFF800000> : vector<4xf32>
    %46 = vector.multi_reduction <maximumf>, %45, %cst_18 [1] : vector<4x4xf32> to vector<4xf32>
    %47 = vector.shape_cast %46 : vector<4xf32> to vector<4x1xf32>
    %48 = vector.broadcast %47 : vector<4x1xf32> to vector<4x4xf32>
    %49 = arith.subf %45, %48 : vector<4x4xf32>
    %50 = math.exp %49 : vector<4x4xf32>
    %cst_19 = arith.constant dense<0.000000e+00> : vector<4xf32>
    %51 = vector.multi_reduction <add>, %50, %cst_19 [1] : vector<4x4xf32> to vector<4xf32>
    %52 = vector.shape_cast %51 : vector<4xf32> to vector<4x1xf32>
    %53 = tpu.reciprocal %52 {approx = true} : vector<4x1xf32> -> vector<4x1xf32>
    %54 = vector.broadcast %53 : vector<4x1xf32> to vector<4x4xf32>
    %55 = arith.mulf %50, %54 : vector<4x4xf32>
    %cst_20 = arith.constant dense<0.000000e+00> : vector<4x16xf32>
    %56 = tpu.matmul %55, %44, %cst_20 {dimension_numbers = #tpu.dot_dimension_numbers<[1], [0], [0], [1], [0, 0, 1, 1], [], []>} : vector<4x4xf32>, vector<4x16xf32>, vector<4x16xf32> -> vector<4x16xf32>
    %57 = vector.extract_strided_slice %41 {offsets = [0, 16], sizes = [4, 16], strides = [1, 1]} : vector<8x96xf32> to vector<4x16xf32>
    %58 = vector.extract_strided_slice %41 {offsets = [0, 48], sizes = [4, 16], strides = [1, 1]} : vector<8x96xf32> to vector<4x16xf32>
    %59 = vector.extract_strided_slice %41 {offsets = [0, 80], sizes = [4, 16], strides = [1, 1]} : vector<8x96xf32> to vector<4x16xf32>
    %cst_21 = arith.constant dense<0.000000e+00> : vector<4x4xf32>
    %60 = tpu.matmul %57, %58, %cst_21 {dimension_numbers = #tpu.dot_dimension_numbers<[1], [1], [0], [0], [0, 0, 1, 0], [], []>} : vector<4x16xf32>, vector<4x16xf32>, vector<4x4xf32> -> vector<4x4xf32>
    %cst_22 = arith.constant dense<0xFF800000> : vector<4xf32>
    %61 = vector.multi_reduction <maximumf>, %60, %cst_22 [1] : vector<4x4xf32> to vector<4xf32>
    %62 = vector.shape_cast %61 : vector<4xf32> to vector<4x1xf32>
    %63 = vector.broadcast %62 : vector<4x1xf32> to vector<4x4xf32>
    %64 = arith.subf %60, %63 : vector<4x4xf32>
    %65 = math.exp %64 : vector<4x4xf32>
    %cst_23 = arith.constant dense<0.000000e+00> : vector<4xf32>
    %66 = vector.multi_reduction <add>, %65, %cst_23 [1] : vector<4x4xf32> to vector<4xf32>
    %67 = vector.shape_cast %66 : vector<4xf32> to vector<4x1xf32>
    %68 = tpu.reciprocal %67 {approx = true} : vector<4x1xf32> -> vector<4x1xf32>
    %69 = vector.broadcast %68 : vector<4x1xf32> to vector<4x4xf32>
    %70 = arith.mulf %65, %69 : vector<4x4xf32>
    %cst_24 = arith.constant dense<0.000000e+00> : vector<4x16xf32>
    %71 = tpu.matmul %70, %59, %cst_24 {dimension_numbers = #tpu.dot_dimension_numbers<[1], [0], [0], [1], [0, 0, 1, 1], [], []>} : vector<4x4xf32>, vector<4x16xf32>, vector<4x16xf32> -> vector<4x16xf32>
    %72 = tpu.concatenate %56, %71 in 1 : vector<4x16xf32>, vector<4x16xf32> -> vector<4x32xf32>
    %73 = vector.extract_strided_slice %41 {offsets = [4, 0], sizes = [4, 16], strides = [1, 1]} : vector<8x96xf32> to vector<4x16xf32>
    %74 = vector.extract_strided_slice %41 {offsets = [4, 32], sizes = [4, 16], strides = [1, 1]} : vector<8x96xf32> to vector<4x16xf32>
    %75 = vector.extract_strided_slice %41 {offsets = [4, 64], sizes = [4, 16], strides = [1, 1]} : vector<8x96xf32> to vector<4x16xf32>
    %cst_25 = arith.constant dense<0.000000e+00> : vector<4x4xf32>
    %76 = tpu.matmul %73, %74, %cst_25 {dimension_numbers = #tpu.dot_dimension_numbers<[1], [1], [0], [0], [0, 0, 1, 0], [], []>} : vector<4x16xf32>, vector<4x16xf32>, vector<4x4xf32> -> vector<4x4xf32>
    %cst_26 = arith.constant dense<0xFF800000> : vector<4xf32>
    %77 = vector.multi_reduction <maximumf>, %76, %cst_26 [1] : vector<4x4xf32> to vector<4xf32>
    %78 = vector.shape_cast %77 : vector<4xf32> to vector<4x1xf32>
    %79 = vector.broadcast %78 : vector<4x1xf32> to vector<4x4xf32>
    %80 = arith.subf %76, %79 : vector<4x4xf32>
    %81 = math.exp %80 : vector<4x4xf32>
    %cst_27 = arith.constant dense<0.000000e+00> : vector<4xf32>
    %82 = vector.multi_reduction <add>, %81, %cst_27 [1] : vector<4x4xf32> to vector<4xf32>
    %83 = vector.shape_cast %82 : vector<4xf32> to vector<4x1xf32>
    %84 = tpu.reciprocal %83 {approx = true} : vector<4x1xf32> -> vector<4x1xf32>
    %85 = vector.broadcast %84 : vector<4x1xf32> to vector<4x4xf32>
    %86 = arith.mulf %81, %85 : vector<4x4xf32>
    %cst_28 = arith.constant dense<0.000000e+00> : vector<4x16xf32>
    %87 = tpu.matmul %86, %75, %cst_28 {dimension_numbers = #tpu.dot_dimension_numbers<[1], [0], [0], [1], [0, 0, 1, 1], [], []>} : vector<4x4xf32>, vector<4x16xf32>, vector<4x16xf32> -> vector<4x16xf32>
    %88 = vector.extract_strided_slice %41 {offsets = [4, 16], sizes = [4, 16], strides = [1, 1]} : vector<8x96xf32> to vector<4x16xf32>
    %89 = vector.extract_strided_slice %41 {offsets = [4, 48], sizes = [4, 16], strides = [1, 1]} : vector<8x96xf32> to vector<4x16xf32>
    %90 = vector.extract_strided_slice %41 {offsets = [4, 80], sizes = [4, 16], strides = [1, 1]} : vector<8x96xf32> to vector<4x16xf32>
    %cst_29 = arith.constant dense<0.000000e+00> : vector<4x4xf32>
    %91 = tpu.matmul %88, %89, %cst_29 {dimension_numbers = #tpu.dot_dimension_numbers<[1], [1], [0], [0], [0, 0, 1, 0], [], []>} : vector<4x16xf32>, vector<4x16xf32>, vector<4x4xf32> -> vector<4x4xf32>
    %cst_30 = arith.constant dense<0xFF800000> : vector<4xf32>
    %92 = vector.multi_reduction <maximumf>, %91, %cst_30 [1] : vector<4x4xf32> to vector<4xf32>
    %93 = vector.shape_cast %92 : vector<4xf32> to vector<4x1xf32>
    %94 = vector.broadcast %93 : vector<4x1xf32> to vector<4x4xf32>
    %95 = arith.subf %91, %94 : vector<4x4xf32>
    %96 = math.exp %95 : vector<4x4xf32>
    %cst_31 = arith.constant dense<0.000000e+00> : vector<4xf32>
    %97 = vector.multi_reduction <add>, %96, %cst_31 [1] : vector<4x4xf32> to vector<4xf32>
    %98 = vector.shape_cast %97 : vector<4xf32> to vector<4x1xf32>
    %99 = tpu.reciprocal %98 {approx = true} : vector<4x1xf32> -> vector<4x1xf32>
    %100 = vector.broadcast %99 : vector<4x1xf32> to vector<4x4xf32>
    %101 = arith.mulf %96, %100 : vector<4x4xf32>
    %cst_32 = arith.constant dense<0.000000e+00> : vector<4x16xf32>
    %102 = tpu.matmul %101, %90, %cst_32 {dimension_numbers = #tpu.dot_dimension_numbers<[1], [0], [0], [1], [0, 0, 1, 1], [], []>} : vector<4x4xf32>, vector<4x16xf32>, vector<4x16xf32> -> vector<4x16xf32>
    %103 = tpu.concatenate %87, %102 in 1 : vector<4x16xf32>, vector<4x16xf32> -> vector<4x32xf32>
    %104 = tpu.concatenate %72, %103 in 0 : vector<4x32xf32>, vector<4x32xf32> -> vector<8x32xf32>
    %c0_33 = arith.constant 0 : index
    %c0_34 = arith.constant 0 : index
    %c0_35 = arith.constant 0 : index
    %105 = vector.load %arg5[%c0_33, %c0_34, %c0_35] : memref<2x32x32xf32, #tpu.memory_space<vmem>>, vector<1x32x32xf32>
    %106 = vector.shape_cast %105 : vector<1x32x32xf32> to vector<32x32xf32>
    %cst_36 = arith.constant dense<0.000000e+00> : vector<8x32xf32>
    %107 = tpu.matmul %104, %106, %cst_36 {dimension_numbers = #tpu.dot_dimension_numbers<[1], [0], [0], [1], [0, 0, 1, 1], [], []>} : vector<8x32xf32>, vector<32x32xf32>, vector<8x32xf32> -> vector<8x32xf32>
    %108 = vector.broadcast %11 : vector<1x32xf32> to vector<8x32xf32>
    %109 = arith.addf %107, %108 : vector<8x32xf32>
    %110 = arith.addf %4, %109 : vector<8x32xf32>
    %cst_37 = arith.constant dense<0.000000e+00> : vector<8xf32>
    %111 = vector.multi_reduction <add>, %110, %cst_37 [1] : vector<8x32xf32> to vector<8xf32>
    %112 = vector.shape_cast %111 : vector<8xf32> to vector<8x1xf32>
    %cst_38 = arith.constant 3.200000e+01 : f32
    %113 = vector.broadcast %cst_38 : f32 to vector<8x1xf32>
    %114 = arith.divf %112, %113 : vector<8x1xf32>
    %115 = vector.broadcast %114 : vector<8x1xf32> to vector<8x32xf32>
    %116 = arith.subf %110, %115 : vector<8x32xf32>
    %117 = arith.mulf %116, %116 : vector<8x32xf32>
    %cst_39 = arith.constant dense<0.000000e+00> : vector<8xf32>
    %118 = vector.multi_reduction <add>, %117, %cst_39 [1] : vector<8x32xf32> to vector<8xf32>
    %119 = vector.shape_cast %118 : vector<8xf32> to vector<8x1xf32>
    %cst_40 = arith.constant 3.200000e+01 : f32
    %120 = vector.broadcast %cst_40 : f32 to vector<8x1xf32>
    %121 = arith.divf %119, %120 : vector<8x1xf32>
    %122 = vector.broadcast %114 : vector<8x1xf32> to vector<8x32xf32>
    %123 = arith.subf %110, %122 : vector<8x32xf32>
    %cst_41 = arith.constant 9.99999974E-6 : f32
    %124 = vector.broadcast %cst_41 : f32 to vector<8x1xf32>
    %125 = arith.addf %121, %124 : vector<8x1xf32>
    %126 = math.rsqrt %125 : vector<8x1xf32>
    %127 = vector.broadcast %126 : vector<8x1xf32> to vector<8x32xf32>
    %128 = arith.mulf %123, %127 : vector<8x32xf32>
    %129 = vector.broadcast %9 : vector<1x32xf32> to vector<8x32xf32>
    %130 = arith.mulf %128, %129 : vector<8x32xf32>
    %131 = vector.broadcast %10 : vector<1x32xf32> to vector<8x32xf32>
    %132 = arith.addf %130, %131 : vector<8x32xf32>
    %c0_42 = arith.constant 0 : index
    %c0_43 = arith.constant 0 : index
    %c0_44 = arith.constant 0 : index
    %133 = vector.load %arg6[%c0_42, %c0_43, %c0_44] : memref<2x32x128xf32, #tpu.memory_space<vmem>>, vector<1x32x128xf32>
    %134 = vector.shape_cast %133 : vector<1x32x128xf32> to vector<32x128xf32>
    %cst_45 = arith.constant dense<0.000000e+00> : vector<8x128xf32>
    %135 = tpu.matmul %132, %134, %cst_45 {dimension_numbers = #tpu.dot_dimension_numbers<[1], [0], [0], [1], [0, 0, 1, 1], [], []>} : vector<8x32xf32>, vector<32x128xf32>, vector<8x128xf32> -> vector<8x128xf32>
    %136 = vector.broadcast %14 : vector<1x128xf32> to vector<8x128xf32>
    %137 = arith.addf %135, %136 : vector<8x128xf32>
    %138 = arith.mulf %137, %137 : vector<8x128xf32>
    %139 = arith.mulf %137, %138 : vector<8x128xf32>
    %cst_46 = arith.constant 4.471500e-02 : f32
    %140 = vector.broadcast %cst_46 : f32 to vector<8x128xf32>
    %141 = arith.mulf %140, %139 : vector<8x128xf32>
    %142 = arith.addf %137, %141 : vector<8x128xf32>
    %cst_47 = arith.constant 0.797884583 : f32
    %143 = vector.broadcast %cst_47 : f32 to vector<8x128xf32>
    %144 = arith.mulf %143, %142 : vector<8x128xf32>
    %145 = math.tanh %144 : vector<8x128xf32>
    %cst_48 = arith.constant 1.000000e+00 : f32
    %146 = vector.broadcast %cst_48 : f32 to vector<8x128xf32>
    %147 = arith.addf %146, %145 : vector<8x128xf32>
    %cst_49 = arith.constant 5.000000e-01 : f32
    %148 = vector.broadcast %cst_49 : f32 to vector<8x128xf32>
    %149 = arith.mulf %148, %147 : vector<8x128xf32>
    %150 = arith.mulf %137, %149 : vector<8x128xf32>
    %c0_50 = arith.constant 0 : index
    %c0_51 = arith.constant 0 : index
    %c0_52 = arith.constant 0 : index
    %151 = vector.load %arg7[%c0_50, %c0_51, %c0_52] : memref<2x128x32xf32, #tpu.memory_space<vmem>>, vector<1x128x32xf32>
    %152 = vector.shape_cast %151 : vector<1x128x32xf32> to vector<128x32xf32>
    %cst_53 = arith.constant dense<0.000000e+00> : vector<8x32xf32>
    %153 = tpu.matmul %150, %152, %cst_53 {dimension_numbers = #tpu.dot_dimension_numbers<[1], [0], [0], [1], [0, 0, 1, 1], [], []>} : vector<8x128xf32>, vector<128x32xf32>, vector<8x32xf32> -> vector<8x32xf32>
    %154 = vector.broadcast %12 : vector<1x32xf32> to vector<8x32xf32>
    %155 = arith.addf %153, %154 : vector<8x32xf32>
    %156 = arith.addf %110, %155 : vector<8x32xf32>
    %c1 = arith.constant 1 : index
    %c0_54 = arith.constant 0 : index
    %c0_55 = arith.constant 0 : index
    %157 = vector.load %arg8[%c1, %c0_54, %c0_55] : memref<2x8x128xf32, #tpu.memory_space<vmem>>, vector<1x8x128xf32>
    %158 = vector.shape_cast %157 : vector<1x8x128xf32> to vector<8x128xf32>
    %159 = vector.extract_strided_slice %158 {offsets = [0, 0], sizes = [1, 32], strides = [1, 1]} : vector<8x128xf32> to vector<1x32xf32>
    %160 = vector.extract_strided_slice %158 {offsets = [1, 0], sizes = [1, 32], strides = [1, 1]} : vector<8x128xf32> to vector<1x32xf32>
    %161 = vector.extract_strided_slice %158 {offsets = [2, 0], sizes = [1, 32], strides = [1, 1]} : vector<8x128xf32> to vector<1x32xf32>
    %162 = vector.extract_strided_slice %158 {offsets = [3, 0], sizes = [1, 32], strides = [1, 1]} : vector<8x128xf32> to vector<1x32xf32>
    %163 = vector.extract_strided_slice %158 {offsets = [4, 0], sizes = [1, 32], strides = [1, 1]} : vector<8x128xf32> to vector<1x32xf32>
    %164 = vector.extract_strided_slice %158 {offsets = [5, 0], sizes = [1, 32], strides = [1, 1]} : vector<8x128xf32> to vector<1x32xf32>
    %165 = vector.extract_strided_slice %158 {offsets = [6, 0], sizes = [1, 96], strides = [1, 1]} : vector<8x128xf32> to vector<1x96xf32>
    %166 = vector.extract_strided_slice %158 {offsets = [7, 0], sizes = [1, 128], strides = [1, 1]} : vector<8x128xf32> to vector<1x128xf32>
    %cst_56 = arith.constant dense<0.000000e+00> : vector<8xf32>
    %167 = vector.multi_reduction <add>, %156, %cst_56 [1] : vector<8x32xf32> to vector<8xf32>
    %168 = vector.shape_cast %167 : vector<8xf32> to vector<8x1xf32>
    %cst_57 = arith.constant 3.200000e+01 : f32
    %169 = vector.broadcast %cst_57 : f32 to vector<8x1xf32>
    %170 = arith.divf %168, %169 : vector<8x1xf32>
    %171 = vector.broadcast %170 : vector<8x1xf32> to vector<8x32xf32>
    %172 = arith.subf %156, %171 : vector<8x32xf32>
    %173 = arith.mulf %172, %172 : vector<8x32xf32>
    %cst_58 = arith.constant dense<0.000000e+00> : vector<8xf32>
    %174 = vector.multi_reduction <add>, %173, %cst_58 [1] : vector<8x32xf32> to vector<8xf32>
    %175 = vector.shape_cast %174 : vector<8xf32> to vector<8x1xf32>
    %cst_59 = arith.constant 3.200000e+01 : f32
    %176 = vector.broadcast %cst_59 : f32 to vector<8x1xf32>
    %177 = arith.divf %175, %176 : vector<8x1xf32>
    %178 = vector.broadcast %170 : vector<8x1xf32> to vector<8x32xf32>
    %179 = arith.subf %156, %178 : vector<8x32xf32>
    %cst_60 = arith.constant 9.99999974E-6 : f32
    %180 = vector.broadcast %cst_60 : f32 to vector<8x1xf32>
    %181 = arith.addf %177, %180 : vector<8x1xf32>
    %182 = math.rsqrt %181 : vector<8x1xf32>
    %183 = vector.broadcast %182 : vector<8x1xf32> to vector<8x32xf32>
    %184 = arith.mulf %179, %183 : vector<8x32xf32>
    %185 = vector.broadcast %159 : vector<1x32xf32> to vector<8x32xf32>
    %186 = arith.mulf %184, %185 : vector<8x32xf32>
    %187 = vector.broadcast %160 : vector<1x32xf32> to vector<8x32xf32>
    %188 = arith.addf %186, %187 : vector<8x32xf32>
    %c1_61 = arith.constant 1 : index
    %c0_62 = arith.constant 0 : index
    %c0_63 = arith.constant 0 : index
    %189 = vector.load %arg4[%c1_61, %c0_62, %c0_63] : memref<2x32x96xf32, #tpu.memory_space<vmem>>, vector<1x32x96xf32>
    %190 = vector.shape_cast %189 : vector<1x32x96xf32> to vector<32x96xf32>
    %cst_64 = arith.constant dense<0.000000e+00> : vector<8x96xf32>
    %191 = tpu.matmul %188, %190, %cst_64 {dimension_numbers = #tpu.dot_dimension_numbers<[1], [0], [0], [1], [0, 0, 1, 1], [], []>} : vector<8x32xf32>, vector<32x96xf32>, vector<8x96xf32> -> vector<8x96xf32>
    %192 = vector.broadcast %165 : vector<1x96xf32> to vector<8x96xf32>
    %193 = arith.addf %191, %192 : vector<8x96xf32>
    %194 = vector.extract_strided_slice %193 {offsets = [0, 0], sizes = [4, 16], strides = [1, 1]} : vector<8x96xf32> to vector<4x16xf32>
    %195 = vector.extract_strided_slice %193 {offsets = [0, 32], sizes = [4, 16], strides = [1, 1]} : vector<8x96xf32> to vector<4x16xf32>
    %196 = vector.extract_strided_slice %193 {offsets = [0, 64], sizes = [4, 16], strides = [1, 1]} : vector<8x96xf32> to vector<4x16xf32>
    %cst_65 = arith.constant dense<0.000000e+00> : vector<4x4xf32>
    %197 = tpu.matmul %194, %195, %cst_65 {dimension_numbers = #tpu.dot_dimension_numbers<[1], [1], [0], [0], [0, 0, 1, 0], [], []>} : vector<4x16xf32>, vector<4x16xf32>, vector<4x4xf32> -> vector<4x4xf32>
    %cst_66 = arith.constant dense<0xFF800000> : vector<4xf32>
    %198 = vector.multi_reduction <maximumf>, %197, %cst_66 [1] : vector<4x4xf32> to vector<4xf32>
    %199 = vector.shape_cast %198 : vector<4xf32> to vector<4x1xf32>
    %200 = vector.broadcast %199 : vector<4x1xf32> to vector<4x4xf32>
    %201 = arith.subf %197, %200 : vector<4x4xf32>
    %202 = math.exp %201 : vector<4x4xf32>
    %cst_67 = arith.constant dense<0.000000e+00> : vector<4xf32>
    %203 = vector.multi_reduction <add>, %202, %cst_67 [1] : vector<4x4xf32> to vector<4xf32>
    %204 = vector.shape_cast %203 : vector<4xf32> to vector<4x1xf32>
    %205 = tpu.reciprocal %204 {approx = true} : vector<4x1xf32> -> vector<4x1xf32>
    %206 = vector.broadcast %205 : vector<4x1xf32> to vector<4x4xf32>
    %207 = arith.mulf %202, %206 : vector<4x4xf32>
    %cst_68 = arith.constant dense<0.000000e+00> : vector<4x16xf32>
    %208 = tpu.matmul %207, %196, %cst_68 {dimension_numbers = #tpu.dot_dimension_numbers<[1], [0], [0], [1], [0, 0, 1, 1], [], []>} : vector<4x4xf32>, vector<4x16xf32>, vector<4x16xf32> -> vector<4x16xf32>
    %209 = vector.extract_strided_slice %193 {offsets = [0, 16], sizes = [4, 16], strides = [1, 1]} : vector<8x96xf32> to vector<4x16xf32>
    %210 = vector.extract_strided_slice %193 {offsets = [0, 48], sizes = [4, 16], strides = [1, 1]} : vector<8x96xf32> to vector<4x16xf32>
    %211 = vector.extract_strided_slice %193 {offsets = [0, 80], sizes = [4, 16], strides = [1, 1]} : vector<8x96xf32> to vector<4x16xf32>
    %cst_69 = arith.constant dense<0.000000e+00> : vector<4x4xf32>
    %212 = tpu.matmul %209, %210, %cst_69 {dimension_numbers = #tpu.dot_dimension_numbers<[1], [1], [0], [0], [0, 0, 1, 0], [], []>} : vector<4x16xf32>, vector<4x16xf32>, vector<4x4xf32> -> vector<4x4xf32>
    %cst_70 = arith.constant dense<0xFF800000> : vector<4xf32>
    %213 = vector.multi_reduction <maximumf>, %212, %cst_70 [1] : vector<4x4xf32> to vector<4xf32>
    %214 = vector.shape_cast %213 : vector<4xf32> to vector<4x1xf32>
    %215 = vector.broadcast %214 : vector<4x1xf32> to vector<4x4xf32>
    %216 = arith.subf %212, %215 : vector<4x4xf32>
    %217 = math.exp %216 : vector<4x4xf32>
    %cst_71 = arith.constant dense<0.000000e+00> : vector<4xf32>
    %218 = vector.multi_reduction <add>, %217, %cst_71 [1] : vector<4x4xf32> to vector<4xf32>
    %219 = vector.shape_cast %218 : vector<4xf32> to vector<4x1xf32>
    %220 = tpu.reciprocal %219 {approx = true} : vector<4x1xf32> -> vector<4x1xf32>
    %221 = vector.broadcast %220 : vector<4x1xf32> to vector<4x4xf32>
    %222 = arith.mulf %217, %221 : vector<4x4xf32>
    %cst_72 = arith.constant dense<0.000000e+00> : vector<4x16xf32>
    %223 = tpu.matmul %222, %211, %cst_72 {dimension_numbers = #tpu.dot_dimension_numbers<[1], [0], [0], [1], [0, 0, 1, 1], [], []>} : vector<4x4xf32>, vector<4x16xf32>, vector<4x16xf32> -> vector<4x16xf32>
    %224 = tpu.concatenate %208, %223 in 1 : vector<4x16xf32>, vector<4x16xf32> -> vector<4x32xf32>
    %225 = vector.extract_strided_slice %193 {offsets = [4, 0], sizes = [4, 16], strides = [1, 1]} : vector<8x96xf32> to vector<4x16xf32>
    %226 = vector.extract_strided_slice %193 {offsets = [4, 32], sizes = [4, 16], strides = [1, 1]} : vector<8x96xf32> to vector<4x16xf32>
    %227 = vector.extract_strided_slice %193 {offsets = [4, 64], sizes = [4, 16], strides = [1, 1]} : vector<8x96xf32> to vector<4x16xf32>
    %cst_73 = arith.constant dense<0.000000e+00> : vector<4x4xf32>
    %228 = tpu.matmul %225, %226, %cst_73 {dimension_numbers = #tpu.dot_dimension_numbers<[1], [1], [0], [0], [0, 0, 1, 0], [], []>} : vector<4x16xf32>, vector<4x16xf32>, vector<4x4xf32> -> vector<4x4xf32>
    %cst_74 = arith.constant dense<0xFF800000> : vector<4xf32>
    %229 = vector.multi_reduction <maximumf>, %228, %cst_74 [1] : vector<4x4xf32> to vector<4xf32>
    %230 = vector.shape_cast %229 : vector<4xf32> to vector<4x1xf32>
    %231 = vector.broadcast %230 : vector<4x1xf32> to vector<4x4xf32>
    %232 = arith.subf %228, %231 : vector<4x4xf32>
    %233 = math.exp %232 : vector<4x4xf32>
    %cst_75 = arith.constant dense<0.000000e+00> : vector<4xf32>
    %234 = vector.multi_reduction <add>, %233, %cst_75 [1] : vector<4x4xf32> to vector<4xf32>
    %235 = vector.shape_cast %234 : vector<4xf32> to vector<4x1xf32>
    %236 = tpu.reciprocal %235 {approx = true} : vector<4x1xf32> -> vector<4x1xf32>
    %237 = vector.broadcast %236 : vector<4x1xf32> to vector<4x4xf32>
    %238 = arith.mulf %233, %237 : vector<4x4xf32>
    %cst_76 = arith.constant dense<0.000000e+00> : vector<4x16xf32>
    %239 = tpu.matmul %238, %227, %cst_76 {dimension_numbers = #tpu.dot_dimension_numbers<[1], [0], [0], [1], [0, 0, 1, 1], [], []>} : vector<4x4xf32>, vector<4x16xf32>, vector<4x16xf32> -> vector<4x16xf32>
    %240 = vector.extract_strided_slice %193 {offsets = [4, 16], sizes = [4, 16], strides = [1, 1]} : vector<8x96xf32> to vector<4x16xf32>
    %241 = vector.extract_strided_slice %193 {offsets = [4, 48], sizes = [4, 16], strides = [1, 1]} : vector<8x96xf32> to vector<4x16xf32>
    %242 = vector.extract_strided_slice %193 {offsets = [4, 80], sizes = [4, 16], strides = [1, 1]} : vector<8x96xf32> to vector<4x16xf32>
    %cst_77 = arith.constant dense<0.000000e+00> : vector<4x4xf32>
    %243 = tpu.matmul %240, %241, %cst_77 {dimension_numbers = #tpu.dot_dimension_numbers<[1], [1], [0], [0], [0, 0, 1, 0], [], []>} : vector<4x16xf32>, vector<4x16xf32>, vector<4x4xf32> -> vector<4x4xf32>
    %cst_78 = arith.constant dense<0xFF800000> : vector<4xf32>
    %244 = vector.multi_reduction <maximumf>, %243, %cst_78 [1] : vector<4x4xf32> to vector<4xf32>
    %245 = vector.shape_cast %244 : vector<4xf32> to vector<4x1xf32>
    %246 = vector.broadcast %245 : vector<4x1xf32> to vector<4x4xf32>
    %247 = arith.subf %243, %246 : vector<4x4xf32>
    %248 = math.exp %247 : vector<4x4xf32>
    %cst_79 = arith.constant dense<0.000000e+00> : vector<4xf32>
    %249 = vector.multi_reduction <add>, %248, %cst_79 [1] : vector<4x4xf32> to vector<4xf32>
    %250 = vector.shape_cast %249 : vector<4xf32> to vector<4x1xf32>
    %251 = tpu.reciprocal %250 {approx = true} : vector<4x1xf32> -> vector<4x1xf32>
    %252 = vector.broadcast %251 : vector<4x1xf32> to vector<4x4xf32>
    %253 = arith.mulf %248, %252 : vector<4x4xf32>
    %cst_80 = arith.constant dense<0.000000e+00> : vector<4x16xf32>
    %254 = tpu.matmul %253, %242, %cst_80 {dimension_numbers = #tpu.dot_dimension_numbers<[1], [0], [0], [1], [0, 0, 1, 1], [], []>} : vector<4x4xf32>, vector<4x16xf32>, vector<4x16xf32> -> vector<4x16xf32>
    %255 = tpu.concatenate %239, %254 in 1 : vector<4x16xf32>, vector<4x16xf32> -> vector<4x32xf32>
    %256 = tpu.concatenate %224, %255 in 0 : vector<4x32xf32>, vector<4x32xf32> -> vector<8x32xf32>
    %c1_81 = arith.constant 1 : index
    %c0_82 = arith.constant 0 : index
    %c0_83 = arith.constant 0 : index
    %257 = vector.load %arg5[%c1_81, %c0_82, %c0_83] : memref<2x32x32xf32, #tpu.memory_space<vmem>>, vector<1x32x32xf32>
    %258 = vector.shape_cast %257 : vector<1x32x32xf32> to vector<32x32xf32>
    %cst_84 = arith.constant dense<0.000000e+00> : vector<8x32xf32>
    %259 = tpu.matmul %256, %258, %cst_84 {dimension_numbers = #tpu.dot_dimension_numbers<[1], [0], [0], [1], [0, 0, 1, 1], [], []>} : vector<8x32xf32>, vector<32x32xf32>, vector<8x32xf32> -> vector<8x32xf32>
    %260 = vector.broadcast %163 : vector<1x32xf32> to vector<8x32xf32>
    %261 = arith.addf %259, %260 : vector<8x32xf32>
    %262 = arith.addf %156, %261 : vector<8x32xf32>
    %cst_85 = arith.constant dense<0.000000e+00> : vector<8xf32>
    %263 = vector.multi_reduction <add>, %262, %cst_85 [1] : vector<8x32xf32> to vector<8xf32>
    %264 = vector.shape_cast %263 : vector<8xf32> to vector<8x1xf32>
    %cst_86 = arith.constant 3.200000e+01 : f32
    %265 = vector.broadcast %cst_86 : f32 to vector<8x1xf32>
    %266 = arith.divf %264, %265 : vector<8x1xf32>
    %267 = vector.broadcast %266 : vector<8x1xf32> to vector<8x32xf32>
    %268 = arith.subf %262, %267 : vector<8x32xf32>
    %269 = arith.mulf %268, %268 : vector<8x32xf32>
    %cst_87 = arith.constant dense<0.000000e+00> : vector<8xf32>
    %270 = vector.multi_reduction <add>, %269, %cst_87 [1] : vector<8x32xf32> to vector<8xf32>
    %271 = vector.shape_cast %270 : vector<8xf32> to vector<8x1xf32>
    %cst_88 = arith.constant 3.200000e+01 : f32
    %272 = vector.broadcast %cst_88 : f32 to vector<8x1xf32>
    %273 = arith.divf %271, %272 : vector<8x1xf32>
    %274 = vector.broadcast %266 : vector<8x1xf32> to vector<8x32xf32>
    %275 = arith.subf %262, %274 : vector<8x32xf32>
    %cst_89 = arith.constant 9.99999974E-6 : f32
    %276 = vector.broadcast %cst_89 : f32 to vector<8x1xf32>
    %277 = arith.addf %273, %276 : vector<8x1xf32>
    %278 = math.rsqrt %277 : vector<8x1xf32>
    %279 = vector.broadcast %278 : vector<8x1xf32> to vector<8x32xf32>
    %280 = arith.mulf %275, %279 : vector<8x32xf32>
    %281 = vector.broadcast %161 : vector<1x32xf32> to vector<8x32xf32>
    %282 = arith.mulf %280, %281 : vector<8x32xf32>
    %283 = vector.broadcast %162 : vector<1x32xf32> to vector<8x32xf32>
    %284 = arith.addf %282, %283 : vector<8x32xf32>
    %c1_90 = arith.constant 1 : index
    %c0_91 = arith.constant 0 : index
    %c0_92 = arith.constant 0 : index
    %285 = vector.load %arg6[%c1_90, %c0_91, %c0_92] : memref<2x32x128xf32, #tpu.memory_space<vmem>>, vector<1x32x128xf32>
    %286 = vector.shape_cast %285 : vector<1x32x128xf32> to vector<32x128xf32>
    %cst_93 = arith.constant dense<0.000000e+00> : vector<8x128xf32>
    %287 = tpu.matmul %284, %286, %cst_93 {dimension_numbers = #tpu.dot_dimension_numbers<[1], [0], [0], [1], [0, 0, 1, 1], [], []>} : vector<8x32xf32>, vector<32x128xf32>, vector<8x128xf32> -> vector<8x128xf32>
    %288 = vector.broadcast %166 : vector<1x128xf32> to vector<8x128xf32>
    %289 = arith.addf %287, %288 : vector<8x128xf32>
    %290 = arith.mulf %289, %289 : vector<8x128xf32>
    %291 = arith.mulf %289, %290 : vector<8x128xf32>
    %cst_94 = arith.constant 4.471500e-02 : f32
    %292 = vector.broadcast %cst_94 : f32 to vector<8x128xf32>
    %293 = arith.mulf %292, %291 : vector<8x128xf32>
    %294 = arith.addf %289, %293 : vector<8x128xf32>
    %cst_95 = arith.constant 0.797884583 : f32
    %295 = vector.broadcast %cst_95 : f32 to vector<8x128xf32>
    %296 = arith.mulf %295, %294 : vector<8x128xf32>
    %297 = math.tanh %296 : vector<8x128xf32>
    %cst_96 = arith.constant 1.000000e+00 : f32
    %298 = vector.broadcast %cst_96 : f32 to vector<8x128xf32>
    %299 = arith.addf %298, %297 : vector<8x128xf32>
    %cst_97 = arith.constant 5.000000e-01 : f32
    %300 = vector.broadcast %cst_97 : f32 to vector<8x128xf32>
    %301 = arith.mulf %300, %299 : vector<8x128xf32>
    %302 = arith.mulf %289, %301 : vector<8x128xf32>
    %c1_98 = arith.constant 1 : index
    %c0_99 = arith.constant 0 : index
    %c0_100 = arith.constant 0 : index
    %303 = vector.load %arg7[%c1_98, %c0_99, %c0_100] : memref<2x128x32xf32, #tpu.memory_space<vmem>>, vector<1x128x32xf32>
    %304 = vector.shape_cast %303 : vector<1x128x32xf32> to vector<128x32xf32>
    %cst_101 = arith.constant dense<0.000000e+00> : vector<8x32xf32>
    %305 = tpu.matmul %302, %304, %cst_101 {dimension_numbers = #tpu.dot_dimension_numbers<[1], [0], [0], [1], [0, 0, 1, 1], [], []>} : vector<8x128xf32>, vector<128x32xf32>, vector<8x32xf32> -> vector<8x32xf32>
    %306 = vector.broadcast %164 : vector<1x32xf32> to vector<8x32xf32>
    %307 = arith.addf %305, %306 : vector<8x32xf32>
    %308 = arith.addf %262, %307 : vector<8x32xf32>
    %c0_102 = arith.constant 0 : index
    %c0_103 = arith.constant 0 : index
    %309 = vector.load %arg9[%c0_102, %c0_103] : memref<3x128xf32, #tpu.memory_space<vmem>>, vector<1x32xf32>
    %c1_104 = arith.constant 1 : index
    %c0_105 = arith.constant 0 : index
    %310 = vector.load %arg9[%c1_104, %c0_105] : memref<3x128xf32, #tpu.memory_space<vmem>>, vector<1x32xf32>
    %c2 = arith.constant 2 : index
    %c0_106 = arith.constant 0 : index
    %311 = vector.load %arg9[%c2, %c0_106] : memref<3x128xf32, #tpu.memory_space<vmem>>, vector<1x128xf32>
    %cst_107 = arith.constant dense<0.000000e+00> : vector<8xf32>
    %312 = vector.multi_reduction <add>, %308, %cst_107 [1] : vector<8x32xf32> to vector<8xf32>
    %313 = vector.shape_cast %312 : vector<8xf32> to vector<8x1xf32>
    %cst_108 = arith.constant 3.200000e+01 : f32
    %314 = vector.broadcast %cst_108 : f32 to vector<8x1xf32>
    %315 = arith.divf %313, %314 : vector<8x1xf32>
    %316 = vector.broadcast %315 : vector<8x1xf32> to vector<8x32xf32>
    %317 = arith.subf %308, %316 : vector<8x32xf32>
    %318 = arith.mulf %317, %317 : vector<8x32xf32>
    %cst_109 = arith.constant dense<0.000000e+00> : vector<8xf32>
    %319 = vector.multi_reduction <add>, %318, %cst_109 [1] : vector<8x32xf32> to vector<8xf32>
    %320 = vector.shape_cast %319 : vector<8xf32> to vector<8x1xf32>
    %cst_110 = arith.constant 3.200000e+01 : f32
    %321 = vector.broadcast %cst_110 : f32 to vector<8x1xf32>
    %322 = arith.divf %320, %321 : vector<8x1xf32>
    %323 = vector.broadcast %315 : vector<8x1xf32> to vector<8x32xf32>
    %324 = arith.subf %308, %323 : vector<8x32xf32>
    %cst_111 = arith.constant 9.99999974E-6 : f32
    %325 = vector.broadcast %cst_111 : f32 to vector<8x1xf32>
    %326 = arith.addf %322, %325 : vector<8x1xf32>
    %327 = math.rsqrt %326 : vector<8x1xf32>
    %328 = vector.broadcast %327 : vector<8x1xf32> to vector<8x32xf32>
    %329 = arith.mulf %324, %328 : vector<8x32xf32>
    %330 = vector.broadcast %309 : vector<1x32xf32> to vector<8x32xf32>
    %331 = arith.mulf %329, %330 : vector<8x32xf32>
    %332 = vector.broadcast %310 : vector<1x32xf32> to vector<8x32xf32>
    %333 = arith.addf %331, %332 : vector<8x32xf32>
    %334 = vector.extract_strided_slice %333 {offsets = [0, 0], sizes = [4, 32], strides = [1, 1]} : vector<8x32xf32> to vector<4x32xf32>
    %cst_112 = arith.constant dense<0.000000e+00> : vector<32xf32>
    %335 = vector.multi_reduction <add>, %334, %cst_112 [0] : vector<4x32xf32> to vector<32xf32>
    %336 = vector.shape_cast %335 : vector<32xf32> to vector<1x32xf32>
    %cst_113 = arith.constant 4.000000e+00 : f32
    %337 = vector.broadcast %cst_113 : f32 to vector<1x32xf32>
    %338 = arith.divf %336, %337 : vector<1x32xf32>
    %339 = vector.extract_strided_slice %333 {offsets = [4, 0], sizes = [4, 32], strides = [1, 1]} : vector<8x32xf32> to vector<4x32xf32>
    %cst_114 = arith.constant dense<0.000000e+00> : vector<32xf32>
    %340 = vector.multi_reduction <add>, %339, %cst_114 [0] : vector<4x32xf32> to vector<32xf32>
    %341 = vector.shape_cast %340 : vector<32xf32> to vector<1x32xf32>
    %cst_115 = arith.constant 4.000000e+00 : f32
    %342 = vector.broadcast %cst_115 : f32 to vector<1x32xf32>
    %343 = arith.divf %341, %342 : vector<1x32xf32>
    %344 = tpu.concatenate %338, %343 in 0 : vector<1x32xf32>, vector<1x32xf32> -> vector<2x32xf32>
    %cst_116 = arith.constant dense<0.000000e+00> : vector<2xf32>
    %345 = vector.multi_reduction <add>, %344, %cst_116 [1] : vector<2x32xf32> to vector<2xf32>
    %346 = vector.shape_cast %345 : vector<2xf32> to vector<2x1xf32>
    %cst_117 = arith.constant 3.200000e+01 : f32
    %347 = vector.broadcast %cst_117 : f32 to vector<2x1xf32>
    %348 = arith.divf %346, %347 : vector<2x1xf32>
    %349 = vector.broadcast %348 : vector<2x1xf32> to vector<2x32xf32>
    %350 = arith.subf %344, %349 : vector<2x32xf32>
    %351 = arith.mulf %350, %350 : vector<2x32xf32>
    %cst_118 = arith.constant dense<0.000000e+00> : vector<2xf32>
    %352 = vector.multi_reduction <add>, %351, %cst_118 [1] : vector<2x32xf32> to vector<2xf32>
    %353 = vector.shape_cast %352 : vector<2xf32> to vector<2x1xf32>
    %cst_119 = arith.constant 3.200000e+01 : f32
    %354 = vector.broadcast %cst_119 : f32 to vector<2x1xf32>
    %355 = arith.divf %353, %354 : vector<2x1xf32>
    %356 = vector.broadcast %348 : vector<2x1xf32> to vector<2x32xf32>
    %357 = arith.subf %344, %356 : vector<2x32xf32>
    %cst_120 = arith.constant 9.99999974E-6 : f32
    %358 = vector.broadcast %cst_120 : f32 to vector<2x1xf32>
    %359 = arith.addf %355, %358 : vector<2x1xf32>
    %360 = math.rsqrt %359 : vector<2x1xf32>
    %361 = vector.broadcast %360 : vector<2x1xf32> to vector<2x32xf32>
    %362 = arith.mulf %357, %361 : vector<2x32xf32>
    %c0_121 = arith.constant 0 : index
    %c0_122 = arith.constant 0 : index
    %363 = vector.load %arg10[%c0_121, %c0_122] : memref<32x128xf32, #tpu.memory_space<vmem>>, vector<32x128xf32>
    %cst_123 = arith.constant dense<0.000000e+00> : vector<2x128xf32>
    %364 = tpu.matmul %362, %363, %cst_123 {dimension_numbers = #tpu.dot_dimension_numbers<[1], [0], [0], [1], [0, 0, 1, 1], [], []>} : vector<2x32xf32>, vector<32x128xf32>, vector<2x128xf32> -> vector<2x128xf32>
    %365 = vector.broadcast %311 : vector<1x128xf32> to vector<2x128xf32>
    %366 = arith.addf %364, %365 : vector<2x128xf32>
    %c0_124 = arith.constant 0 : index
    %c0_125 = arith.constant 0 : index
    %367 = vector.load %arg11[%c0_124, %c0_125] : memref<2x128xf32, #tpu.memory_space<vmem>>, vector<2x128xf32>
    tpu.vector_store %arg11[%c0_124, %c0_125], %366 {strides = array<i32>} : memref<2x128xf32, #tpu.memory_space<vmem>>, vector<2x128xf32>,
    return
  }
  func.func @transform_0(%arg0: i32) -> (i32, i32) {
    %c0_i32 = arith.constant 0 : i32
    %c0_i32_0 = arith.constant 0 : i32
    %c0_i32_1 = arith.constant 0 : i32
    return %c0_i32, %c0_i32_0 : i32, i32
  }
  func.func @transform_1(%arg0: i32) -> (i32, i32) {
    %c0_i32 = arith.constant 0 : i32
    %c0_i32_0 = arith.constant 0 : i32
    %c0_i32_1 = arith.constant 0 : i32
    return %c0_i32, %c0_i32_0 : i32, i32
  }
  func.func @transform_2(%arg0: i32) -> (i32, i32) {
    %c0_i32 = arith.constant 0 : i32
    %c0_i32_0 = arith.constant 0 : i32
    %c0_i32_1 = arith.constant 0 : i32
    return %c0_i32, %c0_i32_0 : i32, i32
  }
  func.func @transform_3(%arg0: i32) -> (i32, i32, i32) {
    %c0_i32 = arith.constant 0 : i32
    %c0_i32_0 = arith.constant 0 : i32
    %c0_i32_1 = arith.constant 0 : i32
    %c0_i32_2 = arith.constant 0 : i32
    return %c0_i32, %c0_i32_0, %c0_i32_1 : i32, i32, i32
  }
  func.func @transform_4(%arg0: i32) -> (i32, i32, i32) {
    %c0_i32 = arith.constant 0 : i32
    %c0_i32_0 = arith.constant 0 : i32
    %c0_i32_1 = arith.constant 0 : i32
    %c0_i32_2 = arith.constant 0 : i32
    return %c0_i32, %c0_i32_0, %c0_i32_1 : i32, i32, i32
  }
  func.func @transform_5(%arg0: i32) -> (i32, i32, i32) {
    %c0_i32 = arith.constant 0 : i32
    %c0_i32_0 = arith.constant 0 : i32
    %c0_i32_1 = arith.constant 0 : i32
    %c0_i32_2 = arith.constant 0 : i32
    return %c0_i32, %c0_i32_0, %c0_i32_1 : i32, i32, i32
  }
  func.func @transform_6(%arg0: i32) -> (i32, i32, i32) {
    %c0_i32 = arith.constant 0 : i32
    %c0_i32_0 = arith.constant 0 : i32
    %c0_i32_1 = arith.constant 0 : i32
    %c0_i32_2 = arith.constant 0 : i32
    return %c0_i32, %c0_i32_0, %c0_i32_1 : i32, i32, i32
  }
  func.func @transform_7(%arg0: i32) -> (i32, i32, i32) {
    %c0_i32 = arith.constant 0 : i32
    %c0_i32_0 = arith.constant 0 : i32
    %c0_i32_1 = arith.constant 0 : i32
    %c0_i32_2 = arith.constant 0 : i32
    return %c0_i32, %c0_i32_0, %c0_i32_1 : i32, i32, i32
  }
  func.func @transform_8(%arg0: i32) -> (i32, i32) {
    %c0_i32 = arith.constant 0 : i32
    %c0_i32_0 = arith.constant 0 : i32
    %c0_i32_1 = arith.constant 0 : i32
    return %c0_i32, %c0_i32_0 : i32, i32
  }
  func.func @transform_9(%arg0: i32) -> (i32, i32) {
    %c0_i32 = arith.constant 0 : i32
    %c0_i32_0 = arith.constant 0 : i32
    %c0_i32_1 = arith.constant 0 : i32
    return %c0_i32, %c0_i32_0 : i32, i32
  }
  func.func @transform_10(%arg0: i32) -> (i32, i32) {
    %c0_i32 = arith.constant 0 : i32
    %c0_i32_0 = arith.constant 0 : i32
    %c0_i32_1 = arith.constant 0 : i32
    return %c0_i32, %c0_i32_0 : i32, i32
  }
}

</mosaic_0001>

<bundles_post_ra>
// kernel: finetuning_model_forward.1
= control target key start
LH: loop header
LB: loop body
LE: loop exit
PB: predicated region body
PF: predicated region fallthrough
CT: control target
= control target key end

     0   :  { %v3049_v3 = vmov 0.0|0.0   ;;  %vm63_vm0 = vcmask 523264   ;;  %s3701_s0 = inlined_call_operand.vmem [shape: f32[8,192], index: 0, kind: input, shape index: {}]   ;;  %s3702_s1 = inlined_call_operand.vmem [shape: f32[8,32], index: 1, kind: input, shape index: {}]   ;;  %s3703_s2 = inlined_call_operand.vmem [shape: f32[192,32], index: 2, kind: input, shape index: {}]   ;;  %s3704_s3 = inlined_call_operand.vmem [shape: f32[2,32,96], index: 3, kind: input, shape index: {}]   ;;  %s3705_s4 = inlined_call_operand.vmem [shape: f32[2,32,32], index: 4, kind: input, shape index: {}]   ;;  %s3706_s5 = inlined_call_operand.vmem [shape: f32[2,32,128], index: 5, kind: input, shape index: {}]   ;;  %s3707_s6 = inlined_call_operand.vmem [shape: f32[2,128,32], index: 6, kind: input, shape index: {}]   ;;  %s3708_s7 = inlined_call_operand.vmem [shape: f32[2,8,128], index: 7, kind: input, shape index: {}]   ;;  %s3709_s8 = inlined_call_operand.vmem [shape: f32[3,128], index: 8, kind: input, shape index: {}]   ;;  %s3710_s9 = inlined_call_operand.vmem [shape: f32[32,128], index: 9, kind: input, shape index: {}]   ;;  %s3711_s10 = inlined_call_operand.hbm [shape: f32[2,128], index: 10, kind: output, shape index: {}]  }
   0x1   :  { %v38_v0 = vld [vmem:[%s3703_s2] sm:$0xff]  ;;  %v39_v1 = vld [vmem:[%s3703_s2 + $0x8] sm:$0xff]  ;;  %v40_v2 = vld [vmem:[%s3703_s2 + $0x10] sm:$0xff]  ;;  %2841 = vmatprep.subr.bf16.mxu0 %v3049_v3  ;;  %2877 = vmatprep.subr.bf16.mxu1 %v3049_v3 }
   0x2   :  { %v2842_v4 = vpack.c.bf16 %v39_v1, %v38_v0  ;;  %v41_v5 = vld [vmem:[%s3703_s2 + $0x18] sm:$0xff]  ;;  %v42_v7 = vld [vmem:[%s3703_s2 + $0x20] sm:$0xff]  ;;  %v43_v8 = vld [vmem:[%s3703_s2 + $0x28] sm:$0xff] }
   0x3   :  { %v2845_v6 = vpack.c.bf16 %v41_v5, %v40_v2  ;;  %v2848_v9 = vpack.c.bf16 %v43_v8, %v42_v7  ;;  %v44_v10 = vld [vmem:[%s3703_s2 + $0x30] sm:$0xff]  ;;  %v45_v11 = vld [vmem:[%s3703_s2 + $0x38] sm:$0xff]  ;;  %v37_v12 = vld [vmem:[%s3701_s0 + $0x8] sm:$0xff] }
   0x4   :  { %2843 = vmatpush1.bf16.msra.mxu0 %v2842_v4  ;;  %2441 = vmatprep.mubr.msk.f32.mxu0 %vm63_vm0, %v37_v12 }
   0x5   :  { %2844 = vmatprep.subr.bf16.mxu0 %v3049_v3 }
   0x8   :  { %2846 = vmatpush1.bf16.msra.mxu0 %v2845_v6 }
   0x9   :  { %2847 = vmatprep.subr.bf16.mxu0 %v3049_v3 }
   0xa   :  { %15 = vsyncpa [#allocation3], 0  ;;  %v2851_v13 = vpack.c.bf16 %v45_v11, %v44_v10  ;;  %v46_v14 = vld [vmem:[%s3703_s2 + $0x40] sm:$0xff]  ;;  %v47_v15 = vld [vmem:[%s3703_s2 + $0x48] sm:$0xff]  ;;  %vm138_vm1 = vcmask 261120   ;;  %vm3050_vm2 = vmmov 0   ;;  %v153_v58 = vlaneseq }
   0xb   :  { %v2854_v16 = vpack.c.bf16 %v47_v15, %v46_v14  ;;  %v48_v17 = vld [vmem:[%s3703_s2 + $0x50] sm:$0xff]  ;;  %v49_v18 = vld [vmem:[%s3703_s2 + $0x58] sm:$0xff]  ;;  %v50_v20 = vld [vmem:[%s3703_s2 + $0x60] sm:$0xff]  ;;  %v3051_v54 = vmov 0.0   ;;  %s3052_s14 = smov 64   ;;  %s3053_s15 = smov 96  }
   0xc   :  { %2849 = vmatpush1.bf16.msra.mxu0 %v2848_v9  ;;  %v2857_v19 = vpack.c.bf16 %v49_v18, %v48_v17  ;;  %v51_v21 = vld [vmem:[%s3703_s2 + $0x68] sm:$0xff]  ;;  %v52_v23 = vld [vmem:[%s3703_s2 + $0x70] sm:$0xff]  ;;  %v53_v24 = vld [vmem:[%s3703_s2 + $0x78] sm:$0xff]  ;;  %2622 = vmatprep.mubr.msk.f32.mxu1 %vm3050_vm2, %v3051_v54  ;;  %v3233_v60 = vshrl.u32 %v153_v58, 7  ;;  %s3054_s16 = smov 80   ;;  %vm247_vm3 = vcmask 130048  }
   0xd   :  { %2850 = vmatprep.subr.bf16.mxu0 %v3049_v3  ;;  %v2860_v22 = vpack.c.bf16 %v51_v21, %v50_v20  ;;  %v2863_v25 = vpack.c.bf16 %v53_v24, %v52_v23  ;;  %v54_v26 = vld [vmem:[%s3703_s2 + $0x80] sm:$0xff]  ;;  %v55_v27 = vld [vmem:[%s3703_s2 + $0x88] sm:$0xff]  ;;  %v56_v29 = vld [vmem:[%s3703_s2 + $0x90] sm:$0xff]  ;;  %vm340_vm4 = vcmask 1043456   ;;  %vm322_vm5 = vcmask 27648   ;;  %s3055_s17 = smov 112  }
   0xe   :  { %v2866_v28 = vpack.c.bf16 %v55_v27, %v54_v26  ;;  %v57_v30 = vld [vmem:[%s3703_s2 + $0x98] sm:$0xff]  ;;  %v58_v32 = vld [vmem:[%s3703_s2 + $0xa0] sm:$0xff]  ;;  %v59_v33 = vld [vmem:[%s3703_s2 + $0xa8] sm:$0xff]  ;;  %v155_v61 = vsub.s32 0, %v3233_v60  ;;  %v160_v63 = vsub.s32 1, %v3233_v60  ;;  %v169_v7 = vsub.s32 6, %v3233_v60 }
   0xf   :  { %v2869_v31 = vpack.c.bf16 %v57_v30, %v56_v29  ;;  %v2872_v34 = vpack.c.bf16 %v59_v33, %v58_v32  ;;  %v60_v35 = vld [vmem:[%s3703_s2 + $0xb0] sm:$0xff]  ;;  %v61_v36 = vld [vmem:[%s3703_s2 + $0xb8] sm:$0xff]  ;;  %v36_v38 = vld [vmem:[%s3701_s0] sm:$0xff]  ;;  %vm336_vm6 = vcmask 31744   ;;  %s3056_s18 = smov 48   ;;  %s3057_s19 = smov 16  }
  0x10   :  { %2852 = vmatpush1.bf16.msra.mxu0 %v2851_v13  ;;  %v2875_v37 = vpack.c.bf16 %v61_v36, %v60_v35  ;;  %v62_v39 = vld [vmem:[%s3702_s1] sm:$0xff]  ;;  %v164_v50 = vld [vmem:[%s3704_s3 + $0x8] sm:$0xff]  ;;  %v165_v51 = vld [vmem:[%s3704_s3 + $0x10] sm:$0xff]  ;;  %vm2308_vm7 = vcmask 257024   ;;  %vm2329_vm8 = vcmask 1040384   ;;  %vm2331_vm9 = vcmask 254976  }
  0x11   :  { %2853 = vmatprep.subr.bf16.mxu0 %v3049_v3  ;;  %v163_v49 = vld [vmem:[%s3704_s3] sm:$0xff]  ;;  %v166_v53 = vld [vmem:[%s3704_s3 + $0x18] sm:$0xff]  ;;  %s3058_s0 = smov [#allocation2]  }
  0x12   :  { %v2878_v52 = vpack.c.bf16 %v164_v50, %v163_v49  ;;  %v2881_v55 = vpack.c.bf16 %v166_v53, %v165_v51  ;;  %v3239_v62 = vld [vmem:[%s3708_s7] sm:$0xff] }
  0x13   :  { %v156_v0 = vrot.slane %v3239_v62, %v155_v61  ;;  %v161_v4 = vrot.slane %v3239_v62, %v160_v63  ;;  %v170_v8 = vrot.slane %v3239_v62, %v169_v7 }
  0x14   :  { %2855 = vmatpush1.bf16.msra.mxu0 %v2854_v16  ;;  %2879 = vmatpush3.bf16.msra.mxu1 %v2878_v52 }
  0x15   :  { %2856 = vmatprep.subr.bf16.mxu0 %v3049_v3  ;;  %2880 = vmatprep.subr.bf16.mxu1 %v3049_v3 }
  0x18   :  { %2858 = vmatpush1.bf16.msra.mxu0 %v2857_v19  ;;  %2882 = vmatpush3.bf16.msra.mxu1 %v2881_v55 }
  0x19   :  { %2859 = vmatprep.subr.bf16.mxu0 %v3049_v3  ;;  %2625 = vmatprep.subr.mxu1 %v3051_v54 }
  0x1c   :  { %2861 = vmatpush1.bf16.msra.mxu0 %v2860_v22 }
  0x1d   :  { %2862 = vmatprep.subr.bf16.mxu0 %v3049_v3 }
  0x20   :  { %2864 = vmatpush1.bf16.msra.mxu0 %v2863_v25 }
  0x21   :  { %2865 = vmatprep.subr.bf16.mxu0 %v3049_v3 }
  0x24   :  { %2867 = vmatpush1.bf16.msra.mxu0 %v2866_v28 }
  0x25   :  { %2868 = vmatprep.subr.bf16.mxu0 %v3049_v3 }
  0x28   :  { %2870 = vmatpush1.bf16.msra.mxu0 %v2869_v31 }
  0x29   :  { %2871 = vmatprep.subr.bf16.mxu0 %v3049_v3 }
  0x2c   :  { %2873 = vmatpush1.bf16.msra.mxu0 %v2872_v34 }
  0x2d   :  { %2874 = vmatprep.subr.bf16.mxu0 %v3049_v3 }
  0x30   :  { %2876 = vmatpush1.bf16.msra.mxu0 %v2875_v37 }
  0x31   :  { %2919 = vmatprep.subr.bf16.mxu0 %v3049_v3 }
  0x33   :  { %132 = vmatmul.mubr.f32.vlgmr.msra.gmra.mrb[0].mxu0 %v36_v38 }
  0x34   :  { %2730 = vmatprep.mubr.msk.f32.mxu0 %vm3050_vm2, %v3051_v54 }
 0x106   :  { %v133_v40 = vpop.f32.mrb[0].mxu0 }
 0x107   :  { %v3209_v41 = vadd.f32 %v133_v40, %v62_v39  ;;  %v135_v42 = vpop.f32.mrb[1].mxu0 }
 0x109   :  { %v139_v43 = vsel %vm138_vm1, %v3209_v41, 0.0 }
 0x10a   :  { %140 = vadd.xlane.f32.xlu0 %v139_v43 }
 0x197   :  { %v141_v44 = vpop.xlane.xlu0 %140 }
 0x198   :  { %v143_v45 = vmul.f32 0.03125, %v141_v44 }
 0x19a   :  { %v144_v46 = vsub.f32 %v3209_v41, %v143_v45 }
 0x19c   :  { %v145_v47 = vmul.f32 %v144_v46, %v144_v46 }
 0x19e   :  { %v146_v48 = vsel %vm138_vm1, %v145_v47, 0.0 }
 0x19f   :  { %147 = vadd.xlane.f32.xlu0 %v146_v48 }
 0x22c   :  { %v148_v56 = vpop.xlane.xlu0 %147 }
 0x22d   :  { %v149_v57 = vmul.f32 0.03125, %v148_v56 }
 0x22f   :  { %v150_v59 = vadd.f32 1e-05, %v149_v57 }
 0x231   :  { %2977 = vrsqrt.f32 %v150_v59 }
 0x23b   :  { %v2978_v1 = vpop.eup %2977 }
 0x23c   :  { %v152_v2 = vmul.f32 %v2978_v1, %v144_v46 }
 0x23e   :  { %v157_v5 = vmul.f32 %v156_v0, %v152_v2 }
 0x240   :  { %v162_v6 = vadd.f32 %v161_v4, %v157_v5 }
 0x242   :  { %2623 = vmatmul.mubr.msk.f32.vlgmr.msra.gmra.mrb[0].mxu1 %vm138_vm1, %v162_v6 }
 0x243   :  { %2627 = vmatprep.mubr.msk.f32.mxu1 %vm3050_vm2, %v3051_v54 }
 0x315   :  { %v240_v9 = vpop.f32.mrb[0].mxu1 }
 0x316   :  { %v241_v10 = vadd.f32 %v240_v9, %v170_v8  ;;  %v2624_v11 = vpop.f32.mrb[1].mxu1 }
 0x318   :  { %334 = vrot.lane.b32.xlu0 %v241_v10, %s3052_s14  ;;  %245 = vrot.lane.b32.xlu1 %v241_v10, %s3053_s15  ;;  %v584_v32 = vrot.slane %v241_v10, 4 }
 0x31c   :  { %415 = vrot.lane.b32.xlu0 %v241_v10, %s3054_s16 }
 0x38a   :  { %v246_v12 = vpop.permute.xlu1 %245  ;;  %v335_v13 = vpop.permute.xlu0 %334 }
 0x38b   :  { %2626 = vmatpush3.xpose.msk.msra.mxu1 %vm247_vm3, %v246_v12 }
 0x38c   :  { %2630 = vmatprep.subr.mxu1 %v3051_v54 }
 0x38e   :  { %2628 = vmatmul.mubr.msk.f32.vlgmr.msra.gmra.mrb[2].mxu1 %vm247_vm3, %v241_v10  ;;  %v416_v22 = vpop.permute.xlu0 %415 }
 0x38f   :  { %2631 = vmatpush3.msk.msra.mxu1 %vm340_vm4, %v335_v13  ;;  %2632 = vmatprep.mubr.msk.f32.mxu1 %vm3050_vm2, %v3051_v54 }
 0x390   :  { %2635 = vmatprep.subr.mxu1 %v3051_v54 }
 0x461   :  { %v318_v14 = vpop.f32.mrb[2].mxu1 }
 0x462   :  { %v2629_v15 = vpop.f32.mrb[3].mxu1  ;;  %v323_v16 = vsel %vm322_vm5, %v318_v14, -inf }
 0x463   :  { %324 = vmax.xlane.f32.xlu1 %v323_v16 }
 0x4f0   :  { %v325_v17 = vpop.xlane.xlu1 %324 }
 0x4f1   :  { %v326_v18 = vsub.f32 %v318_v14, %v325_v17  ;;  %v924_v17 = vld [vmem:[%s3705_s4] sm:$0xff] }
 0x4f3   :  { %v327_v19 = vmul.f32 1.442695, %v326_v18  ;;  %v925_v18 = vld [vmem:[%s3705_s4 + $0x8] sm:$0xff] }
 0x4f5   :  { %2979 = vpow2.f32 %v327_v19  ;;  %v2884_v19 = vpack.c.bf16 %v925_v18, %v924_v17  ;;  %v1129_v17 = vld [vmem:[%s3707_s6 + $0x50] sm:$0xff] }
 0x4ff   :  { %v2980_v20 = vpop.eup %2979 }
 0x500   :  { %v329_v21 = vsel %vm322_vm5, %v2980_v20, 0.0 }
 0x501   :  { %330 = vadd.xlane.f32.xlu0 %v329_v21  ;;  %v927_v21 = vld [vmem:[%s3705_s4 + $0x18] sm:$0xff] }
 0x517   :  { %413 = vrot.lane.b32.xlu0 %v241_v10, %s3055_s17 }
 0x58e   :  { %v331_v23 = vpop.xlane.xlu0 %330 }
 0x58f   :  { %2981 = vrcp.f32 %v331_v23 }
 0x592   :  { %v414_v26 = vpop.permute.xlu0 %413 }
 0x599   :  { %v2982_v24 = vpop.eup %2981 }
 0x59a   :  { %v333_v25 = vmul.f32 %v2982_v24, %v2980_v20  ;;  %v926_v20 = vld [vmem:[%s3705_s4 + $0x10] sm:$0xff] }
 0x59c   :  { %2633 = vmatmul.mubr.msk.f32.vlgmr.msra.gmra.mrb[4].mxu1 %vm336_vm6, %v333_v25 }
 0x59d   :  { %2636 = vmatpush3.xpose.msk.msra.mxu1 %vm247_vm3, %v416_v22  ;;  %2637 = vmatprep.mubr.msk.f32.mxu1 %vm3050_vm2, %v3051_v54  ;;  %v2887_v22 = vpack.c.bf16 %v927_v21, %v926_v20  ;;  %v1131_v21 = vld [vmem:[%s3707_s6 + $0x60] sm:$0xff] }
 0x59e   :  { %2640 = vmatprep.subr.mxu1 %v3051_v54 }
 0x5a0   :  { %2638 = vmatmul.mubr.msk.f32.vlgmr.msra.gmra.mrb[6].mxu1 %vm247_vm3, %v414_v26 }
 0x5a1   :  { %2642 = vmatprep.mubr.msk.f32.mxu1 %vm3050_vm2, %v3051_v54 }
 0x66f   :  { %v3276_v27 = vpop.f32.mrb[4].mxu1 }
 0x670   :  { %v2634_v28 = vpop.f32.mrb[5].mxu1 }
 0x673   :  { %v487_v29 = vpop.f32.mrb[6].mxu1 }
 0x674   :  { %v2639_v30 = vpop.f32.mrb[7].mxu1  ;;  %v491_v31 = vsel %vm322_vm5, %v487_v29, -inf }
 0x675   :  { %492 = vmax.xlane.f32.xlu1 %v491_v31 }
 0x686   :  { %502 = vrot.lane.b32.xlu1 %v241_v10, %s3056_s18 }
 0x68a   :  { %585 = vrot.lane.b32.xlu1 %v584_v32, %s3053_s15 }
 0x702   :  { %v493_v33 = vpop.xlane.xlu1 %492 }
 0x703   :  { %v494_v34 = vsub.f32 %v487_v29, %v493_v33 }
 0x705   :  { %v495_v35 = vmul.f32 1.442695, %v494_v34 }
 0x706   :  { %v503_v36 = vpop.permute.xlu1 %502 }
 0x707   :  { %2983 = vpow2.f32 %v495_v35  ;;  %2641 = vmatpush3.msk.msra.mxu1 %vm340_vm4, %v503_v36 }
 0x708   :  { %2645 = vmatprep.subr.mxu1 %v3051_v54 }
 0x70a   :  { %v586_v43 = vpop.permute.xlu1 %585 }
 0x711   :  { %v2984_v37 = vpop.eup %2983 }
 0x712   :  { %v497_v38 = vsel %vm322_vm5, %v2984_v37, 0.0 }
 0x713   :  { %498 = vadd.xlane.f32.xlu0 %v497_v38 }
 0x729   :  { %672 = vrot.lane.b32.xlu0 %v584_v32, %s3052_s14 }
 0x7a0   :  { %v499_v39 = vpop.xlane.xlu0 %498 }
 0x7a1   :  { %2985 = vrcp.f32 %v499_v39 }
 0x7a4   :  { %v673_v44 = vpop.permute.xlu0 %672 }
 0x7ab   :  { %v2986_v40 = vpop.eup %2985 }
 0x7ac   :  { %v501_v42 = vmul.f32 %v2986_v40, %v2984_v37 }
 0x7ae   :  { %2643 = vmatmul.mubr.msk.f32.vlgmr.msra.gmra.mrb[8].mxu1 %vm336_vm6, %v501_v42 }
 0x7af   :  { %2646 = vmatpush3.xpose.msk.msra.mxu1 %vm247_vm3, %v586_v43  ;;  %2647 = vmatprep.mubr.msk.f32.mxu1 %vm3050_vm2, %v3051_v54 }
 0x7b0   :  { %2650 = vmatprep.subr.mxu1 %v3051_v54 }
 0x7b2   :  { %2648 = vmatmul.mubr.msk.f32.vlgmr.msra.gmra.mrb[10].mxu1 %vm247_vm3, %v584_v32 }
 0x7b3   :  { %2651 = vmatpush3.msk.msra.mxu1 %vm340_vm4, %v673_v44  ;;  %2652 = vmatprep.mubr.msk.f32.mxu1 %vm3050_vm2, %v3051_v54  ;;  %v1029_v44 = vld [vmem:[%s3706_s5] sm:$0xff] }
 0x7b4   :  { %2655 = vmatprep.subr.mxu1 %v3051_v54 }
 0x881   :  { %v575_v45 = vpop.f32.mrb[8].mxu1 }
 0x882   :  { %v2644_v46 = vpop.f32.mrb[9].mxu1 }
 0x883   :  { %v1031_v46 = vld [vmem:[%s3706_s5 + $0x10] sm:$0xff] }
 0x885   :  { %v657_v47 = vpop.f32.mrb[10].mxu1 }
 0x886   :  { %v2649_v48 = vpop.f32.mrb[11].mxu1  ;;  %v661_v49 = vsel %vm322_vm5, %v657_v47, -inf }
 0x887   :  { %662 = vmax.xlane.f32.xlu1 %v661_v49 }
 0x898   :  { %749 = vrot.lane.b32.xlu1 %v584_v32, %s3055_s17 }
 0x914   :  { %v663_v50 = vpop.xlane.xlu1 %662 }
 0x915   :  { %v664_v51 = vsub.f32 %v657_v47, %v663_v50  ;;  %v1032_v47 = vld [vmem:[%s3706_s5 + $0x18] sm:$0xff] }
 0x916   :  { %v2893_v48 = vpack.c.bf16 %v1032_v47, %v1031_v46 }
 0x917   :  { %v665_v52 = vmul.f32 1.442695, %v664_v51 }
 0x918   :  { %v750_v0 = vpop.permute.xlu1 %749 }
 0x919   :  { %2987 = vpow2.f32 %v665_v52  ;;  %v1021_v52 = vsub.s32 2, %v3233_v60 }
 0x923   :  { %v2988_v53 = vpop.eup %2987 }
 0x924   :  { %v667_v55 = vsel %vm322_vm5, %v2988_v53, 0.0 }
 0x925   :  { %668 = vadd.xlane.f32.xlu0 %v667_v55  ;;  %v1022_v55 = vrot.slane %v3239_v62, %v1021_v52 }
 0x93b   :  { %751 = vrot.lane.b32.xlu0 %v584_v32, %s3054_s16 }
 0x9b2   :  { %v669_v56 = vpop.xlane.xlu0 %668 }
 0x9b3   :  { %2989 = vrcp.f32 %v669_v56 }
 0x9b6   :  { %v752_v59 = vpop.permute.xlu0 %751 }
 0x9bd   :  { %v2990_v57 = vpop.eup %2989 }
 0x9be   :  { %v671_v58 = vmul.f32 %v2990_v57, %v2988_v53  ;;  %v1026_v53 = vsub.s32 3, %v3233_v60 }
 0x9c0   :  { %2653 = vmatmul.mubr.msk.f32.vlgmr.msra.gmra.mrb[12].mxu1 %vm336_vm6, %v671_v58  ;;  %v1027_v58 = vrot.slane %v3239_v62, %v1026_v53 }
 0x9c1   :  { %2656 = vmatpush3.xpose.msk.msra.mxu1 %vm247_vm3, %v752_v59  ;;  %2657 = vmatprep.mubr.msk.f32.mxu1 %vm3050_vm2, %v3051_v54  ;;  %v1119_v59 = vld [vmem:[%s3707_s6] sm:$0xff] }
 0x9c2   :  { %2660 = vmatprep.subr.mxu1 %v3051_v54 }
 0x9c4   :  { %2658 = vmatmul.mubr.msk.f32.vlgmr.msra.gmra.mrb[14].mxu1 %vm247_vm3, %v750_v0  ;;  %v1120_v0 = vld [vmem:[%s3707_s6 + $0x8] sm:$0xff] }
 0x9c5   :  { %2662 = vmatprep.mubr.msk.f32.mxu1 %vm3050_vm2, %v3051_v54 }
 0xa93   :  { %v745_v1 = vpop.f32.mrb[12].mxu1 }
 0xa94   :  { %v2654_v2 = vpop.f32.mrb[13].mxu1 }
 0xa95   :  { %v2896_v2 = vpack.c.bf16 %v1120_v0, %v1119_v59  ;;  %v2464_v59 = vld [vmem:[%s3704_s3 + $0x30] sm:$0xff]  ;;  %v2465_v0 = vld [vmem:[%s3704_s3 + $0x38] sm:$0xff] }
 0xa97   :  { %v823_v4 = vpop.f32.mrb[14].mxu1 }
 0xa98   :  { %v2659_v5 = vpop.f32.mrb[15].mxu1  ;;  %v827_v6 = vsel %vm322_vm5, %v823_v4, -inf }
 0xa99   :  { %828 = vmax.xlane.f32.xlu0 %v827_v6  ;;  %v1121_v5 = vld [vmem:[%s3707_s6 + $0x10] sm:$0xff]  ;;  %v1122_v6 = vld [vmem:[%s3707_s6 + $0x18] sm:$0xff] }
 0xaaf   :  { %838 = vrot.lane.b32.xlu0 %v584_v32, %s3056_s18  ;;  %v930_v32 = vsub.s32 4, %v3233_v60 }
 0xab1   :  { %v931_v33 = vrot.slane %v3239_v62, %v930_v32 }
 0xab3   :  { %580 = vrot.lane.b32.xlu0 %v575_v45, %s3057_s19 }
 0xb26   :  { %v829_v8 = vpop.xlane.xlu0 %828 }
 0xb27   :  { %v830_v9 = vsub.f32 %v823_v4, %v829_v8  ;;  %v2899_v8 = vpack.c.bf16 %v1122_v6, %v1121_v5  ;;  %v3464_v6 = vld [vmem:[%s3708_s7 + $0x8] sm:$0xff] }
 0xb29   :  { %v831_v10 = vmul.f32 1.442695, %v830_v9  ;;  %v1123_v9 = vld [vmem:[%s3707_s6 + $0x20] sm:$0xff] }
 0xb2a   :  { %v839_v11 = vpop.permute.xlu0 %838 }
 0xb2b   :  { %2991 = vpow2.f32 %v831_v10  ;;  %2661 = vmatpush3.msk.msra.mxu1 %vm340_vm4, %v839_v11  ;;  %v1124_v10 = vld [vmem:[%s3707_s6 + $0x28] sm:$0xff] }
 0xb2c   :  { %2883 = vmatprep.subr.bf16.mxu1 %v3049_v3  ;;  %v2902_v11 = vpack.c.bf16 %v1124_v10, %v1123_v9  ;;  %v1233_v10 = vrot.slane %v3464_v6, %v160_v63 }
 0xb2e   :  { %v581_v25 = vpop.permute.xlu0 %580 }
 0xb2f   :  { %v583_v30 = vsel %vm247_vm3, %v3276_v27, %v581_v25  ;;  %v1134_v25 = vld [vmem:[%s3707_s6 + $0x78] sm:$0xff] }
 0xb35   :  { %v2992_v12 = vpop.eup %2991 }
 0xb36   :  { %v833_v13 = vsel %vm322_vm5, %v2992_v12, 0.0 }
 0xb37   :  { %834 = vadd.xlane.f32.xlu1 %v833_v13  ;;  %v1126_v13 = vld [vmem:[%s3707_s6 + $0x38] sm:$0xff] }
 0xbc4   :  { %v835_v14 = vpop.xlane.xlu1 %834 }
 0xbc5   :  { %2993 = vrcp.f32 %v835_v14 }
 0xbcf   :  { %v2994_v15 = vpop.eup %2993 }
 0xbd0   :  { %v837_v16 = vmul.f32 %v2994_v15, %v2992_v12  ;;  %v1125_v12 = vld [vmem:[%s3707_s6 + $0x30] sm:$0xff]  ;;  %v1127_v15 = vld [vmem:[%s3707_s6 + $0x40] sm:$0xff] }
 0xbd1   :  { %v2905_v14 = vpack.c.bf16 %v1126_v13, %v1125_v12 }
 0xbd2   :  { %2663 = vmatmul.mubr.msk.f32.vlgmr.msra.gmra.mrb[16].mxu1 %vm336_vm6, %v837_v16  ;;  %v1128_v16 = vld [vmem:[%s3707_s6 + $0x48] sm:$0xff] }
 0xbd3   :  { %2673 = vmatprep.mubr.msk.f32.mxu1 %vm3050_vm2, %v3051_v54  ;;  %2885 = vmatpush3.bf16.msra.mxu1 %v2884_v19  ;;  %v2908_v18 = vpack.c.bf16 %v1128_v16, %v1127_v15  ;;  %v1130_v19 = vld [vmem:[%s3707_s6 + $0x58] sm:$0xff] }
 0xbd4   :  { %2886 = vmatprep.subr.bf16.mxu1 %v3049_v3  ;;  %v2911_v20 = vpack.c.bf16 %v1130_v19, %v1129_v17 }
 0xbd7   :  { %2888 = vmatpush3.bf16.msra.mxu1 %v2887_v22  ;;  %v1132_v22 = vld [vmem:[%s3707_s6 + $0x68] sm:$0xff] }
 0xbd8   :  { %2889 = vmatprep.subr.bf16.mxu1 %v3049_v3 }
 0xca5   :  { %v911_v23 = vpop.f32.mrb[16].mxu1 }
 0xca6   :  { %916 = vrot.lane.b32.xlu1 %v911_v23, %s3057_s19  ;;  %v2664_v24 = vpop.f32.mrb[17].mxu1  ;;  %v2914_v23 = vpack.c.bf16 %v1132_v22, %v1131_v21 }
 0xca7   :  { %v1133_v24 = vld [vmem:[%s3707_s6 + $0x70] sm:$0xff] }
 0xd18   :  { %v917_v26 = vpop.permute.xlu1 %916 }
 0xd19   :  { %v919_v28 = vsel %vm247_vm3, %v745_v1, %v917_v26  ;;  %v2917_v26 = vpack.c.bf16 %v1134_v25, %v1133_v24 }
 0xd1a   :  { %v921_v29 = vrot.slane %v919_v28, 4  ;;  %v1035_v28 = vsub.s32 7, %v3233_v60 }
 0xd1c   :  { %v923_v31 = vsel %vm340_vm4, %v583_v30, %v921_v29  ;;  %v1036_v29 = vrot.slane %v3239_v62, %v1035_v28 }
 0xd1d   :  { %2674 = vmatmul.mubr.msk.f32.vlgmr.msra.gmra.mrb[18].mxu1 %vm138_vm1, %v923_v31 }
 0xd1e   :  { %2684 = vmatprep.mubr.msk.f32.mxu1 %vm3050_vm2, %v3051_v54 }
 0xdf0   :  { %v1001_v34 = vpop.f32.mrb[18].mxu1 }
 0xdf1   :  { %v1002_v35 = vadd.f32 %v1001_v34, %v931_v33  ;;  %v2675_v36 = vpop.f32.mrb[19].mxu1 }
 0xdf3   :  { %v3343_v37 = vadd.f32 %v1002_v35, %v3209_v41  ;;  %v1030_v41 = vld [vmem:[%s3706_s5 + $0x8] sm:$0xff] }
 0xdf4   :  { %v2890_v45 = vpack.c.bf16 %v1030_v41, %v1029_v44  ;;  %v1137_v44 = vsub.s32 5, %v3233_v60 }
 0xdf5   :  { %v1006_v27 = vsel %vm138_vm1, %v3343_v37, 0.0 }
 0xdf6   :  { %1007 = vadd.xlane.f32.xlu0 %v1006_v27  ;;  %2891 = vmatpush3.bf16.msra.mxu1 %v2890_v45  ;;  %v1138_v41 = vrot.slane %v3239_v62, %v1137_v44  ;;  %v2462_v62 = vld [vmem:[%s3704_s3 + $0x20] sm:$0xff] }
 0xdf7   :  { %2892 = vmatprep.subr.bf16.mxu1 %v3049_v3 }
 0xdfa   :  { %2894 = vmatpush3.bf16.msra.mxu1 %v2893_v48 }
 0xdfb   :  { %2895 = vmatprep.subr.bf16.mxu1 %v3049_v3 }
 0xe83   :  { %v1008_v38 = vpop.xlane.xlu0 %1007 }
 0xe84   :  { %v1009_v39 = vmul.f32 0.03125, %v1008_v38 }
 0xe86   :  { %v1010_v40 = vsub.f32 %v3343_v37, %v1009_v39 }
 0xe88   :  { %v1011_v42 = vmul.f32 %v1010_v40, %v1010_v40 }
 0xe8a   :  { %v1012_v43 = vsel %vm138_vm1, %v1011_v42, 0.0 }
 0xe8b   :  { %1013 = vadd.xlane.f32.xlu1 %v1012_v43 }
 0xf18   :  { %v1014_v49 = vpop.xlane.xlu1 %1013 }
 0xf19   :  { %v1015_v50 = vmul.f32 0.03125, %v1014_v49 }
 0xf1b   :  { %v1016_v51 = vadd.f32 1e-05, %v1015_v50 }
 0xf1d   :  { %2995 = vrsqrt.f32 %v1016_v51 }
 0xf27   :  { %v2996_v56 = vpop.eup %2995 }
 0xf28   :  { %v1018_v57 = vmul.f32 %v2996_v56, %v1010_v40 }
 0xf2a   :  { %v1023_v1 = vmul.f32 %v1022_v55, %v1018_v57 }
 0xf2c   :  { %v1028_v4 = vadd.f32 %v1027_v58, %v1023_v1  ;;  %v2923_v1 = vpack.c.bf16 %v2465_v0, %v2464_v59 }
 0xf2e   :  { %2685 = vmatmul.mubr.msk.f32.vlgmr.msra.gmra.mrb[20].mxu1 %vm138_vm1, %v1028_v4 }
 0xf2f   :  { %2897 = vmatpush3.bf16.msra.mxu1 %v2896_v2  ;;  %2719 = vmatprep.mubr.msk.f32.mxu1 %vm3050_vm2, %v3051_v54 }
 0xf30   :  { %2898 = vmatprep.subr.bf16.mxu1 %v3049_v3 }
 0xf33   :  { %2900 = vmatpush3.bf16.msra.mxu1 %v2899_v8  ;;  %v1228_v8 = vrot.slane %v3464_v6, %v155_v61 }
 0xf34   :  { %2901 = vmatprep.subr.bf16.mxu1 %v3049_v3 }
 0xf37   :  { %2903 = vmatpush3.bf16.msra.mxu1 %v2902_v11 }
 0xf38   :  { %2904 = vmatprep.subr.bf16.mxu1 %v3049_v3 }
 0xf3b   :  { %2906 = vmatpush3.bf16.msra.mxu1 %v2905_v14  ;;  %v1243_v14 = vrot.slane %v3464_v6, %v169_v7 }
 0xf3c   :  { %2907 = vmatprep.subr.bf16.mxu1 %v3049_v3 }
 0xf3f   :  { %2909 = vmatpush3.bf16.msra.mxu1 %v2908_v18 }
 0xf40   :  { %2910 = vmatprep.subr.bf16.mxu1 %v3049_v3 }
 0xf43   :  { %2912 = vmatpush3.bf16.msra.mxu1 %v2911_v20 }
 0xf44   :  { %2913 = vmatprep.subr.bf16.mxu1 %v3049_v3 }
 0xf47   :  { %2915 = vmatpush3.bf16.msra.mxu1 %v2914_v23 }
 0xf48   :  { %2916 = vmatprep.subr.bf16.mxu1 %v3049_v3 }
 0xf4b   :  { %2918 = vmatpush3.bf16.msra.mxu1 %v2917_v26 }
 0xf4c   :  { %2733 = vmatprep.subr.mxu1 %v3051_v54 }
0x1001   :  { %v1106_v30 = vpop.f32.mrb[20].mxu1 }
0x1002   :  { %v1107_v31 = vadd.f32 %v1106_v30, %v1036_v29  ;;  %v2686_v33 = vpop.f32.mrb[21].mxu1 }
0x1004   :  { %v1110_v34 = vmul.f32 %v1107_v31, %v1107_v31 }
0x1006   :  { %v1111_v35 = vmul.f32 %v1110_v34, %v1107_v31 }
0x1008   :  { %v1112_v36 = vmul.f32 0.044715, %v1111_v35 }
0x100a   :  { %v1113_v27 = vadd.f32 %v1112_v36, %v1107_v31 }
0x100c   :  { %v1114_v38 = vmul.f32 0.7978846, %v1113_v27 }
0x100e   :  { %2997 = vtanh.f32 %v1114_v38 }
0x1018   :  { %v2998_v39 = vpop.eup %2997 }
0x1019   :  { %v1116_v40 = vadd.f32 1.0, %v2998_v39 }
0x101b   :  { %v1117_v42 = vmul.f32 0.5, %v1116_v40 }
0x101d   :  { %v1118_v43 = vmul.f32 %v1117_v42, %v1107_v31 }
0x101f   :  { %2720 = vmatmul.mubr.f32.vlgmr.msra.gmra.mrb[22].mxu1 %v1118_v43 }
0x1020   :  { %2735 = vmatprep.mubr.msk.f32.mxu1 %vm3050_vm2, %v3051_v54 }
0x10f2   :  { %v1205_v45 = vpop.f32.mrb[22].mxu1 }
0x10f3   :  { %v1206_v46 = vadd.f32 %v1205_v45, %v1138_v41  ;;  %v2721_v47 = vpop.f32.mrb[23].mxu1 }
0x10f5   :  { %v3441_v48 = vadd.f32 %v1206_v46, %v3343_v37  ;;  %v2463_v37 = vld [vmem:[%s3704_s3 + $0x28] sm:$0xff] }
0x10f6   :  { %v2920_v58 = vpack.c.bf16 %v2463_v37, %v2462_v62 }
0x10f7   :  { %v1212_v49 = vsel %vm138_vm1, %v3441_v48, 0.0 }
0x10f8   :  { %1213 = vadd.xlane.f32.xlu0 %v1212_v49  ;;  %2921 = vmatpush3.bf16.msra.mxu0 %v2920_v58 }
0x10f9   :  { %2922 = vmatprep.subr.bf16.mxu0 %v3049_v3 }
0x10fc   :  { %2924 = vmatpush3.bf16.msra.mxu0 %v2923_v1 }
0x10fd   :  { %2738 = vmatprep.subr.mxu0 %v3051_v54 }
0x1185   :  { %v1214_v50 = vpop.xlane.xlu0 %1213 }
0x1186   :  { %v1215_v51 = vmul.f32 0.03125, %v1214_v50 }
0x1188   :  { %v1216_v55 = vsub.f32 %v3441_v48, %v1215_v51 }
0x118a   :  { %v1217_v56 = vmul.f32 %v1216_v55, %v1216_v55 }
0x118c   :  { %v1218_v57 = vsel %vm138_vm1, %v1217_v56, 0.0 }
0x118d   :  { %1219 = vadd.xlane.f32.xlu0 %v1218_v57 }
0x121a   :  { %v1220_v2 = vpop.xlane.xlu0 %1219 }
0x121b   :  { %v1221_v4 = vmul.f32 0.03125, %v1220_v2 }
0x121d   :  { %v1222_v5 = vadd.f32 1e-05, %v1221_v4 }
0x121f   :  { %2999 = vrsqrt.f32 %v1222_v5 }
0x1229   :  { %v3000_v9 = vpop.eup %2999 }
0x122a   :  { %v1224_v11 = vmul.f32 %v3000_v9, %v1216_v55 }
0x122c   :  { %v1229_v12 = vmul.f32 %v1228_v8, %v1224_v11 }
0x122e   :  { %v1234_v13 = vadd.f32 %v1233_v10, %v1229_v12 }
0x1230   :  { %2731 = vmatmul.mubr.msk.f32.vlgmr.msra.gmra.mrb[2].mxu0 %vm138_vm1, %v1234_v13 }
0x1231   :  { %2740 = vmatprep.mubr.msk.f32.mxu0 %vm3050_vm2, %v3051_v54 }
0x1303   :  { %v1313_v15 = vpop.f32.mrb[2].mxu0 }
0x1304   :  { %v1314_v16 = vadd.f32 %v1313_v15, %v1243_v14  ;;  %v2732_v61 = vpop.f32.mrb[3].mxu0 }
0x1306   :  { %1318 = vrot.lane.b32.xlu0 %v1314_v16, %s3053_s15  ;;  %v3489_v24 = vrot.slane %v1314_v16, 4 }
0x130a   :  { %1484 = vrot.lane.b32.xlu0 %v1314_v16, %s3054_s16 }
0x130e   :  { %1482 = vrot.lane.b32.xlu0 %v1314_v16, %s3055_s17 }
0x1378   :  { %v1319_v63 = vpop.permute.xlu0 %1318 }
0x1379   :  { %2734 = vmatpush3.xpose.msk.msra.mxu1 %vm247_vm3, %v1319_v63 }
0x137a   :  { %2758 = vmatprep.subr.mxu1 %v3051_v54 }
0x137c   :  { %2736 = vmatmul.mubr.msk.f32.vlgmr.msra.gmra.mrb[24].mxu1 %vm247_vm3, %v1314_v16  ;;  %v1485_v30 = vpop.permute.xlu0 %1484 }
0x137d   :  { %2760 = vmatprep.mubr.msk.f32.mxu1 %vm3050_vm2, %v3051_v54 }
0x1380   :  { %v1483_v33 = vpop.permute.xlu0 %1482 }
0x144f   :  { %v1390_v7 = vpop.f32.mrb[24].mxu1 }
0x1450   :  { %v2737_v17 = vpop.f32.mrb[25].mxu1  ;;  %v1394_v18 = vsel %vm322_vm5, %v1390_v7, -inf }
0x1451   :  { %1395 = vmax.xlane.f32.xlu1 %v1394_v18 }
0x14de   :  { %v1396_v19 = vpop.xlane.xlu1 %1395 }
0x14df   :  { %v1397_v20 = vsub.f32 %v1390_v7, %v1396_v19 }
0x14e1   :  { %v1398_v21 = vmul.f32 1.442695, %v1397_v20  ;;  %v2483_v20 = vld [vmem:[%s3705_s4 + $0x20] sm:$0xff] }
0x14e3   :  { %3001 = vpow2.f32 %v1398_v21  ;;  %v2484_v21 = vld [vmem:[%s3705_s4 + $0x28] sm:$0xff] }
0x14ed   :  { %v3002_v22 = vpop.eup %3001 }
0x14ee   :  { %v1400_v23 = vsel %vm322_vm5, %v3002_v22, 0.0 }
0x14ef   :  { %1401 = vadd.xlane.f32.xlu1 %v1400_v23  ;;  %v2485_v23 = vld [vmem:[%s3705_s4 + $0x30] sm:$0xff] }
0x1500   :  { %1405 = vrot.lane.b32.xlu1 %v1314_v16, %s3052_s14 }
0x1504   :  { %1654 = vrot.lane.b32.xlu1 %v3489_v24, %s3053_s15 }
0x157c   :  { %v1402_v25 = vpop.xlane.xlu1 %1401 }
0x157d   :  { %3003 = vrcp.f32 %v1402_v25 }
0x1580   :  { %v1406_v26 = vpop.permute.xlu1 %1405 }
0x1581   :  { %2739 = vmatpush3.msk.msra.mxu0 %vm340_vm4, %v1406_v26 }
0x1582   :  { %2743 = vmatprep.subr.mxu0 %v3051_v54 }
0x1584   :  { %v1655_v46 = vpop.permute.xlu1 %1654 }
0x1587   :  { %v3004_v29 = vpop.eup %3003 }
0x1588   :  { %v1404_v31 = vmul.f32 %v3004_v29, %v3002_v22  ;;  %v2926_v22 = vpack.c.bf16 %v2484_v21, %v2483_v20  ;;  %v2505_v21 = vld [vmem:[%s3707_s6 + $0xe0] sm:$0xff] }
0x158a   :  { %2741 = vmatmul.mubr.msk.f32.vlgmr.msra.gmra.mrb[4].mxu0 %vm336_vm6, %v1404_v31 }
0x158b   :  { %2744 = vmatpush3.xpose.msk.msra.mxu0 %vm247_vm3, %v1485_v30  ;;  %2745 = vmatprep.mubr.msk.f32.mxu0 %vm3050_vm2, %v3051_v54 }
0x158c   :  { %2748 = vmatprep.subr.mxu0 %v3051_v54 }
0x158e   :  { %2746 = vmatmul.mubr.msk.f32.vlgmr.msra.gmra.mrb[6].mxu0 %vm247_vm3, %v1483_v33 }
0x158f   :  { %2750 = vmatprep.mubr.msk.f32.mxu0 %vm3050_vm2, %v3051_v54 }
0x165d   :  { %v3503_v34 = vpop.f32.mrb[4].mxu0 }
0x165e   :  { %v2742_v35 = vpop.f32.mrb[5].mxu0 }
0x1661   :  { %v1556_v36 = vpop.f32.mrb[6].mxu0 }
0x1662   :  { %v2747_v27 = vpop.f32.mrb[7].mxu0  ;;  %v1560_v38 = vsel %vm322_vm5, %v1556_v36, -inf }
0x1663   :  { %1561 = vmax.xlane.f32.xlu0 %v1560_v38 }
0x1679   :  { %1571 = vrot.lane.b32.xlu0 %v1314_v16, %s3056_s18 }
0x167d   :  { %1820 = vrot.lane.b32.xlu0 %v3489_v24, %s3054_s16 }
0x16f0   :  { %v1562_v39 = vpop.xlane.xlu0 %1561 }
0x16f1   :  { %v1563_v40 = vsub.f32 %v1556_v36, %v1562_v39 }
0x16f3   :  { %v1564_v42 = vmul.f32 1.442695, %v1563_v40  ;;  %v2001_v40 = vrot.slane %v3464_v6, %v930_v32  ;;  %v2488_v32 = vld [vmem:[%s3706_s5 + $0x20] sm:$0xff] }
0x16f4   :  { %v1572_v43 = vpop.permute.xlu0 %1571 }
0x16f5   :  { %3005 = vpow2.f32 %v1564_v42  ;;  %2749 = vmatpush3.msk.msra.mxu0 %vm340_vm4, %v1572_v43 }
0x16f6   :  { %2753 = vmatprep.subr.mxu0 %v3051_v54 }
0x16f8   :  { %v1821_v51 = vpop.permute.xlu0 %1820 }
0x16ff   :  { %v3006_v41 = vpop.eup %3005 }
0x1700   :  { %v1566_v45 = vsel %vm322_vm5, %v3006_v41, 0.0 }
0x1701   :  { %1567 = vadd.xlane.f32.xlu1 %v1566_v45 }
0x1712   :  { %1818 = vrot.lane.b32.xlu1 %v3489_v24, %s3055_s17 }
0x178e   :  { %v1568_v47 = vpop.xlane.xlu1 %1567 }
0x178f   :  { %3007 = vrcp.f32 %v1568_v47 }
0x1792   :  { %v1819_v55 = vpop.permute.xlu1 %1818 }
0x1799   :  { %v3008_v49 = vpop.eup %3007 }
0x179a   :  { %v1570_v50 = vmul.f32 %v3008_v49, %v3006_v41 }
0x179c   :  { %2751 = vmatmul.mubr.msk.f32.vlgmr.msra.gmra.mrb[8].mxu0 %vm336_vm6, %v1570_v50 }
0x179d   :  { %2754 = vmatpush3.xpose.msk.msra.mxu0 %vm247_vm3, %v1655_v46  ;;  %2755 = vmatprep.mubr.msk.f32.mxu0 %vm3050_vm2, %v3051_v54 }
0x179e   :  { %2763 = vmatprep.subr.mxu0 %v3051_v54 }
0x17a0   :  { %2756 = vmatmul.mubr.msk.f32.vlgmr.msra.gmra.mrb[10].mxu0 %vm247_vm3, %v3489_v24 }
0x17a1   :  { %2764 = vmatpush3.xpose.msk.msra.mxu0 %vm247_vm3, %v1821_v51  ;;  %2765 = vmatprep.mubr.msk.f32.mxu0 %vm3050_vm2, %v3051_v54 }
0x17a2   :  { %2925 = vmatprep.subr.bf16.mxu0 %v3049_v3 }
0x17a4   :  { %2766 = vmatmul.mubr.msk.f32.vlgmr.msra.gmra.mrb[12].mxu0 %vm247_vm3, %v1819_v55 }
0x17a5   :  { %2781 = vmatprep.mubr.msk.f32.mxu0 %vm3050_vm2, %v3051_v54  ;;  %2927 = vmatpush3.bf16.msra.mxu0 %v2926_v22  ;;  %v2506_v22 = vld [vmem:[%s3707_s6 + $0xe8] sm:$0xff] }
0x17a6   :  { %2928 = vmatprep.subr.bf16.mxu0 %v3049_v3 }
0x186f   :  { %v1644_v56 = vpop.f32.mrb[8].mxu0 }
0x1870   :  { %v2752_v57 = vpop.f32.mrb[9].mxu0 }
0x1871   :  { %v2491_v57 = vld [vmem:[%s3706_s5 + $0x38] sm:$0xff] }
0x1873   :  { %v1726_v62 = vpop.f32.mrb[10].mxu0 }
0x1874   :  { %v2757_v37 = vpop.f32.mrb[11].mxu0  ;;  %v1730_v58 = vsel %vm322_vm5, %v1726_v62, -inf }
0x1875   :  { %1731 = vmax.xlane.f32.xlu0 %v1730_v58  ;;  %v2493_v37 = vld [vmem:[%s3707_s6 + $0x80] sm:$0xff]  ;;  %v2494_v58 = vld [vmem:[%s3707_s6 + $0x88] sm:$0xff] }
0x1877   :  { %v1892_v59 = vpop.f32.mrb[12].mxu0 }
0x1878   :  { %v2767_v0 = vpop.f32.mrb[13].mxu0  ;;  %v1896_v1 = vsel %vm322_vm5, %v1892_v59, -inf }
0x1879   :  { %1897 = vmax.xlane.f32.xlu1 %v1896_v1 }
0x188a   :  { %1907 = vrot.lane.b32.xlu1 %v3489_v24, %s3056_s18 }
0x1902   :  { %v1732_v2 = vpop.xlane.xlu0 %1731 }
0x1903   :  { %v1733_v4 = vsub.f32 %v1726_v62, %v1732_v2 }
0x1905   :  { %v1734_v5 = vmul.f32 1.442695, %v1733_v4  ;;  %v2092_v4 = vrot.slane %v3464_v6, %v1021_v52  ;;  %v2496_v52 = vld [vmem:[%s3707_s6 + $0x98] sm:$0xff] }
0x1906   :  { %v1898_v8 = vpop.xlane.xlu1 %1897 }
0x1907   :  { %3009 = vpow2.f32 %v1734_v5  ;;  %v1899_v9 = vsub.f32 %v1892_v59, %v1898_v8  ;;  %v2938_v59 = vpack.c.bf16 %v2494_v58, %v2493_v37  ;;  %v2510_v37 = vld [vmem:[%s3709_s8 + $0x1] ss:$0 sm:$0xff] }
0x1909   :  { %v1900_v10 = vmul.f32 1.442695, %v1899_v9  ;;  %v2097_v9 = vrot.slane %v3464_v6, %v1026_v53  ;;  %v2497_v53 = vld [vmem:[%s3707_s6 + $0xa0] sm:$0xff] }
0x190a   :  { %v1908_v17 = vpop.permute.xlu1 %1907 }
0x190b   :  { %3011 = vpow2.f32 %v1900_v10 }
0x1911   :  { %v3010_v11 = vpop.eup %3009 }
0x1912   :  { %v1736_v12 = vsel %vm322_vm5, %v3010_v11, 0.0 }
0x1913   :  { %1737 = vadd.xlane.f32.xlu0 %v1736_v12  ;;  %v2495_v12 = vld [vmem:[%s3707_s6 + $0x90] sm:$0xff] }
0x1915   :  { %v3012_v13 = vpop.eup %3011 }
0x1916   :  { %v1902_v14 = vsel %vm322_vm5, %v3012_v13, 0.0 }
0x1917   :  { %1903 = vadd.xlane.f32.xlu0 %v1902_v14 }
0x192d   :  { %1741 = vrot.lane.b32.xlu0 %v3489_v24, %s3052_s14  ;;  %v2486_v24 = vld [vmem:[%s3705_s4 + $0x38] sm:$0xff]  ;;  %s2433_s4 = sshll.u32 %s3058_s0, 4  ;;  %s2434_s4 = int_to_ptr.vmem [resolvable:$true] %s2433_s4 }
0x192e   :  { %v2929_v25 = vpack.c.bf16 %v2486_v24, %v2485_v23  ;;  %v2956_v23 = vpack.c.bf16 %v2506_v22, %v2505_v21  ;;  %v2507_v24 = vld [vmem:[%s3707_s6 + $0xf0] sm:$0xff]  ;;  %v2345_v21 = vld [vmem:[%s3710_s9] sm:$0xff]  ;;  %v2346_v22 = vld [vmem:[%s3710_s9 + $0x8] sm:$0xff]  ;;  %p3030_p1 = scmp.lt.s32.totalorder %s2434_s4, %s2434_s4 }
0x1930   :  { %2930 = vmatpush3.bf16.msra.mxu0 %v2929_v25  ;;  %v2508_v25 = vld [vmem:[%s3707_s6 + $0xf8] sm:$0xff] }
0x1931   :  { %2937 = vmatprep.subr.bf16.mxu0 %v3049_v3 }
0x19a0   :  { %v1738_v15 = vpop.xlane.xlu0 %1737 }
0x19a1   :  { %3013 = vrcp.f32 %v1738_v15  ;;  %v2499_v15 = vld [vmem:[%s3707_s6 + $0xb0] sm:$0xff] }
0x19a4   :  { %v1904_v16 = vpop.xlane.xlu0 %1903 }
0x19a5   :  { %3015 = vrcp.f32 %v1904_v16  ;;  %v2500_v16 = vld [vmem:[%s3707_s6 + $0xb8] sm:$0xff] }
0x19a8   :  { %v1742_v61 = vpop.permute.xlu0 %1741 }
0x19a9   :  { %2759 = vmatpush3.msk.msra.mxu1 %vm340_vm4, %v1742_v61  ;;  %v2947_v61 = vpack.c.bf16 %v2500_v16, %v2499_v15 }
0x19aa   :  { %2768 = vmatprep.subr.mxu1 %v3051_v54 }
0x19ab   :  { %v3014_v63 = vpop.eup %3013 }
0x19ac   :  { %v1740_v7 = vmul.f32 %v3014_v63, %v3010_v11  ;;  %v2501_v63 = vld [vmem:[%s3707_s6 + $0xc0] sm:$0xff] }
0x19ae   :  { %2761 = vmatmul.mubr.msk.f32.vlgmr.msra.gmra.mrb[26].mxu1 %vm336_vm6, %v1740_v7  ;;  %v2502_v7 = vld [vmem:[%s3707_s6 + $0xc8] sm:$0xff] }
0x19af   :  { %v3016_v18 = vpop.eup %3015  ;;  %2769 = vmatpush3.msk.msra.mxu1 %vm340_vm4, %v1908_v17  ;;  %2770 = vmatprep.mubr.msk.f32.mxu1 %vm3050_vm2, %v3051_v54  ;;  %v2503_v17 = vld [vmem:[%s3707_s6 + $0xd0] sm:$0xff] }
0x19b0   :  { %v1906_v19 = vmul.f32 %v3016_v18, %v3012_v13  ;;  %2931 = vmatprep.subr.bf16.mxu1 %v3049_v3  ;;  %v2941_v13 = vpack.c.bf16 %v2496_v52, %v2495_v12  ;;  %v2950_v18 = vpack.c.bf16 %v2502_v7, %v2501_v63 }
0x19b2   :  { %2771 = vmatmul.mubr.msk.f32.vlgmr.msra.gmra.mrb[28].mxu1 %vm336_vm6, %v1906_v19  ;;  %v2504_v19 = vld [vmem:[%s3707_s6 + $0xd8] sm:$0xff] }
0x19b3   :  { %2792 = vmatprep.mubr.msk.f32.mxu1 %vm3050_vm2, %v3051_v54  ;;  %v2953_v20 = vpack.c.bf16 %v2504_v19, %v2503_v17 }
0x1a81   :  { %v1814_v26 = vpop.f32.mrb[26].mxu1 }
0x1a82   :  { %v2762_v29 = vpop.f32.mrb[27].mxu1 }
0x1a83   :  { %v2107_v29 = vrot.slane %v3464_v6, %v1035_v28 }
0x1a85   :  { %v1980_v30 = vpop.f32.mrb[28].mxu1 }
0x1a86   :  { %1985 = vrot.lane.b32.xlu1 %v1980_v30, %s3057_s19  ;;  %v2772_v31 = vpop.f32.mrb[29].mxu1 }
0x1a8a   :  { %1649 = vrot.lane.b32.xlu1 %v1644_v56, %s3057_s19  ;;  %v2490_v56 = vld [vmem:[%s3706_s5 + $0x30] sm:$0xff] }
0x1a8b   :  { %v2935_v62 = vpack.c.bf16 %v2491_v57, %v2490_v56 }
0x1af8   :  { %v1986_v33 = vpop.permute.xlu1 %1985 }
0x1af9   :  { %v1988_v35 = vsel %vm247_vm3, %v1814_v26, %v1986_v33  ;;  %v2959_v26 = vpack.c.bf16 %v2508_v25, %v2507_v24  ;;  %v2347_v24 = vld [vmem:[%s3710_s9 + $0x10] sm:$0xff]  ;;  %v2348_v25 = vld [vmem:[%s3710_s9 + $0x18] sm:$0xff]  ;;  %s3025_s9 = scalar_lea.vmem %s2434_s4, 32 }
0x1afa   :  { %v1990_v36 = vrot.slane %v1988_v35, 4  ;;  %p3026_p0 = scmp.ne.s32.totalorder %s2434_s4, %s3025_s9  ;;  %p3031_p2 = scmp.lt.s32.totalorder %s3025_s9, %s3025_s9 }
0x1afc   :  { %v1650_v27 = vpop.permute.xlu1 %1649  ;;  %p3032_p3 = por %p3031_p2, %p3030_p1 }
0x1afd   :  { %v1652_v38 = vsel %vm247_vm3, %v3503_v34, %v1650_v27 }
0x1afe   :  { %v1992_v39 = vsel %vm340_vm4, %v1652_v38, %v1990_v36  ;;  %p3033_p4 = pnand %p3032_p3, %p3026_p0 }
0x1aff   :  { %2782 = vmatmul.mubr.msk.f32.vlgmr.msra.gmra.mrb[14].mxu0 %vm138_vm1, %v1992_v39 }
0x1b00   :  { %2827 = vmatprep.mubr.msk.f32.mxu0 %vm3050_vm2, %v3051_v54  ;;  %2939 = vmatpush3.bf16.msra.mxu0 %v2938_v59 }
0x1b01   :  { %2940 = vmatprep.subr.bf16.mxu0 %v3049_v3 }
0x1b04   :  { %2942 = vmatpush3.bf16.msra.mxu0 %v2941_v13 }
0x1b05   :  { %2943 = vmatprep.subr.bf16.mxu0 %v3049_v3 }
0x1bd2   :  { %v2071_v42 = vpop.f32.mrb[14].mxu0 }
0x1bd3   :  { %v2072_v43 = vadd.f32 %v2071_v42, %v2001_v40  ;;  %v2783_v41 = vpop.f32.mrb[15].mxu0 }
0x1bd5   :  { %v3573_v45 = vadd.f32 %v2072_v43, %v3441_v48  ;;  %v2489_v48 = vld [vmem:[%s3706_s5 + $0x28] sm:$0xff] }
0x1bd6   :  { %v2932_v55 = vpack.c.bf16 %v2489_v48, %v2488_v32 }
0x1bd7   :  { %v2076_v34 = vsel %vm138_vm1, %v3573_v45, 0.0 }
0x1bd8   :  { %2077 = vadd.xlane.f32.xlu0 %v2076_v34  ;;  %2933 = vmatpush3.bf16.msra.mxu1 %v2932_v55  ;;  %v2210_v34 = vrot.slane %v3464_v6, %v1137_v44  ;;  %v2509_v6 = vld [vmem:[%s3709_s8] ss:$0 sm:$0xff] }
0x1bd9   :  { %2934 = vmatprep.subr.bf16.mxu1 %v3049_v3 }
0x1bdc   :  { %2936 = vmatpush3.bf16.msra.mxu1 %v2935_v62 }
0x1bdd   :  { %2961 = vmatprep.subr.bf16.mxu1 %v3049_v3 }
0x1c65   :  { %v2078_v46 = vpop.xlane.xlu0 %2077 }
0x1c66   :  { %v2079_v47 = vmul.f32 0.03125, %v2078_v46 }
0x1c68   :  { %v2080_v49 = vsub.f32 %v3573_v45, %v2079_v47 }
0x1c6a   :  { %v2081_v50 = vmul.f32 %v2080_v49, %v2080_v49 }
0x1c6c   :  { %v2082_v51 = vsel %vm138_vm1, %v2081_v50, 0.0 }
0x1c6d   :  { %2083 = vadd.xlane.f32.xlu1 %v2082_v51 }
0x1cfa   :  { %v2084_v0 = vpop.xlane.xlu1 %2083 }
0x1cfb   :  { %v2085_v1 = vmul.f32 0.03125, %v2084_v0 }
0x1cfd   :  { %v2086_v2 = vadd.f32 1e-05, %v2085_v1 }
0x1cff   :  { %3017 = vrsqrt.f32 %v2086_v2 }
0x1d09   :  { %v3018_v5 = vpop.eup %3017 }
0x1d0a   :  { %v2088_v8 = vmul.f32 %v3018_v5, %v2080_v49 }
0x1d0c   :  { %v2093_v10 = vmul.f32 %v2092_v4, %v2088_v8 }
0x1d0e   :  { %v2098_v11 = vadd.f32 %v2097_v9, %v2093_v10 }
0x1d10   :  { %2793 = vmatmul.mubr.msk.f32.vlgmr.msra.gmra.mrb[30].mxu1 %vm138_vm1, %v2098_v11 }
0x1d11   :  { %2838 = vmatprep.mubr.msk.f32.mxu1 %vm3050_vm2, %v3051_v54  ;;  %v2498_v54 = vld [vmem:[%s3707_s6 + $0xa8] sm:$0xff] }
0x1d12   :  { %v2944_v14 = vpack.c.bf16 %v2498_v54, %v2497_v53 }
0x1d14   :  { %2945 = vmatpush3.bf16.msra.mxu0 %v2944_v14 }
0x1d15   :  { %2946 = vmatprep.subr.bf16.mxu0 %v3049_v3 }
0x1d18   :  { %2948 = vmatpush3.bf16.msra.mxu0 %v2947_v61 }
0x1d19   :  { %2949 = vmatprep.subr.bf16.mxu0 %v3049_v3 }
0x1d1c   :  { %2951 = vmatpush3.bf16.msra.mxu0 %v2950_v18 }
0x1d1d   :  { %2952 = vmatprep.subr.bf16.mxu0 %v3049_v3 }
0x1d20   :  { %2954 = vmatpush3.bf16.msra.mxu0 %v2953_v20 }
0x1d21   :  { %2955 = vmatprep.subr.bf16.mxu0 %v3049_v3 }
0x1d24   :  { %2957 = vmatpush3.bf16.msra.mxu0 %v2956_v23  ;;  %v2962_v23 = vpack.c.bf16 %v2346_v22, %v2345_v21 }
0x1d25   :  { %2958 = vmatprep.subr.bf16.mxu0 %v3049_v3 }
0x1d26   :  { %2963 = vmatpush3.bf16.msra.mxu1 %v2962_v23 }
0x1d27   :  { %2964 = vmatprep.subr.bf16.mxu1 %v3049_v3  ;;  %v2511_v3 = vld [vmem:[%s3709_s8 + $0x2] ss:$0 sm:$0xff] }
0x1d28   :  { %2960 = vmatpush3.bf16.msra.mxu0 %v2959_v26  ;;  %v2965_v26 = vpack.c.bf16 %v2348_v25, %v2347_v24 }
0x1d2a   :  { %2966 = vmatpush3.bf16.msra.mxu1 %v2965_v26 }
0x1de3   :  { %v2177_v30 = vpop.f32.mrb[30].mxu1 }
0x1de4   :  { %v2178_v31 = vadd.f32 %v2177_v30, %v2107_v29  ;;  %v2794_v33 = vpop.f32.mrb[31].mxu1 }
0x1de6   :  { %v2181_v35 = vmul.f32 %v2178_v31, %v2178_v31 }
0x1de8   :  { %v2182_v36 = vmul.f32 %v2181_v35, %v2178_v31 }
0x1dea   :  { %v2183_v27 = vmul.f32 0.044715, %v2182_v36 }
0x1dec   :  { %v2184_v38 = vadd.f32 %v2183_v27, %v2178_v31 }
0x1dee   :  { %v2185_v39 = vmul.f32 0.7978846, %v2184_v38 }
0x1df0   :  { %3019 = vtanh.f32 %v2185_v39 }
0x1dfa   :  { %v3020_v40 = vpop.eup %3019 }
0x1dfb   :  { %v2187_v42 = vadd.f32 1.0, %v3020_v40 }
0x1dfd   :  { %v2188_v43 = vmul.f32 0.5, %v2187_v42 }
0x1dff   :  { %v2189_v41 = vmul.f32 %v2188_v43, %v2178_v31 }
0x1e01   :  { %2828 = vmatmul.mubr.f32.vlgmr.msra.gmra.mrb[16].mxu0 %v2189_v41 }
0x1ed4   :  { %v2277_v46 = vpop.f32.mrb[16].mxu0 }
0x1ed5   :  { %v2278_v28 = vadd.f32 %v2277_v46, %v2210_v34  ;;  %v2829_v47 = vpop.f32.mrb[17].mxu0 }
0x1ed7   :  { %v2281_v49 = vadd.f32 %v2278_v28, %v3573_v45 }
0x1ed9   :  { %v2285_v50 = vsel %vm138_vm1, %v2281_v49, 0.0 }
0x1eda   :  { %2286 = vadd.xlane.f32.xlu0 %v2285_v50 }
0x1f67   :  { %v2287_v51 = vpop.xlane.xlu0 %2286 }
0x1f68   :  { %v2288_v32 = vmul.f32 0.03125, %v2287_v51 }
0x1f6a   :  { %v2289_v48 = vsub.f32 %v2281_v49, %v2288_v32 }
0x1f6c   :  { %v2290_v55 = vmul.f32 %v2289_v48, %v2289_v48 }
0x1f6e   :  { %v2291_v56 = vsel %vm138_vm1, %v2290_v55, 0.0 }
0x1f6f   :  { %2292 = vadd.xlane.f32.xlu0 %v2291_v56 }
0x1ffc   :  { %v2293_v57 = vpop.xlane.xlu0 %2292 }
0x1ffd   :  { %v2294_v62 = vmul.f32 0.03125, %v2293_v57 }
0x1fff   :  { %v2295_v60 = vadd.f32 1e-05, %v2294_v62 }
0x2001   :  { %3021 = vrsqrt.f32 %v2295_v60 }
0x200b   :  { %v3022_v44 = vpop.eup %3021 }
0x200c   :  { %v2297_v45 = vmul.f32 %v3022_v44, %v2289_v48 }
0x200e   :  { %v2302_v58 = vmul.f32 %v2509_v6, %v2297_v45 }
0x2010   :  { %v2307_v59 = vadd.f32 %v2510_v37, %v2302_v58 }
0x2012   :  { %v2309_v0 = vsel %vm2308_vm7, %v2307_v59, 0.0  ;;  %v2319_v1 = vrot.slane %v2307_v59, 4 }
0x2013   :  { %v2310_v2 = vrot.slane %v2309_v0, 4 }
0x2014   :  { %v2321_v4 = vsel %vm2308_vm7, %v2319_v1, 0.0 }
0x2015   :  { %v2311_v5 = vadd.f32 %v2310_v2, %v2309_v0  ;;  %v2322_v8 = vrot.slane %v2321_v4, 4 }
0x2017   :  { %v2312_v9 = vrot.slane %v2311_v5, 2  ;;  %v2323_v10 = vadd.f32 %v2322_v8, %v2321_v4 }
0x2019   :  { %v2313_v11 = vadd.f32 %v2312_v9, %v2311_v5  ;;  %v2324_v12 = vrot.slane %v2323_v10, 2 }
0x201b   :  { %v2314_v52 = vrot.slane %v2313_v11, 1  ;;  %v2325_v13 = vadd.f32 %v2324_v12, %v2323_v10 }
0x201d   :  { %v2315_v53 = vadd.f32 %v2314_v52, %v2313_v11  ;;  %v2326_v54 = vrot.slane %v2325_v13, 1 }
0x201f   :  { %v2327_v14 = vadd.f32 %v2326_v54, %v2325_v13  ;;  %v2317_v15 = vmul.f32 0.25, %v2315_v53 }
0x2021   :  { %v2328_v16 = vmul.f32 0.25, %v2327_v14 }
0x2023   :  { %v2330_v61 = vsel %vm2329_vm8, %v2317_v15, %v2328_v16 }
0x2024   :  { %v2332_v63 = vsel %vm2331_vm9, %v2330_v61, 0.0 }
0x2025   :  { %2333 = vadd.xlane.f32.xlu0 %v2332_v63 }
0x20b2   :  { %v2334_v7 = vpop.xlane.xlu0 %2333 }
0x20b3   :  { %v2335_v17 = vmul.f32 0.03125, %v2334_v7 }
0x20b5   :  { %v2336_v18 = vsub.f32 %v2330_v61, %v2335_v17 }
0x20b7   :  { %v2337_v19 = vmul.f32 %v2336_v18, %v2336_v18 }
0x20b9   :  { %v2338_v20 = vsel %vm2331_vm9, %v2337_v19, 0.0 }
0x20ba   :  { %2339 = vadd.xlane.f32.xlu1 %v2338_v20 }
0x2147   :  { %v2340_v29 = vpop.xlane.xlu1 %2339 }
0x2148   :  { %v2341_v30 = vmul.f32 0.03125, %v2340_v29 }
0x214a   :  { %v2342_v31 = vadd.f32 1e-05, %v2341_v30 }
0x214c   :  { %3023 = vrsqrt.f32 %v2342_v31 }
0x2156   :  { %v3024_v33 = vpop.eup %3023 }
0x2157   :  { %v2344_v35 = vmul.f32 %v3024_v33, %v2336_v18 }
0x2159   :  { %2839 = vmatmul.mubr.msk.f32.vlgmr.msra.gmra.mrb[32].mxu1 %vm138_vm1, %v2344_v35 }
0x222c   :  { %v2422_v36 = vpop.f32.mrb[32].mxu1 }
0x222d   :  { %v2423_v27 = vadd.f32 %v2511_v3, %v2422_v36  ;;  %v2840_v38 = vpop.f32.mrb[33].mxu1 }
0x222f   :  { %2426 = vst [vmem:[#allocation2] sm:$0x3] %v2423_v27 }
0x2230   :  { %3036 = shalt.err (!%p3033_p4)
}
0x2231   :  { %s3037_s1 = scalar_lea.hbm %s3711_s10, 32 }
0x2232   :  { %p3038_p5 = scmp.ne.s32.totalorder %s3711_s10, %s3037_s1  ;;  %p3041_p6 = scmp.lt.u32.totalorder %s3037_s1, %s3711_s10 }
0x2234   :  { %p3043_p7 = pnand %p3041_p6, %p3038_p5 }
0x2236   :  { %3046 = shalt.err (!%p3043_p7)
}
0x2237   :  { %2436 = dma.vmem_to_hbm [thread:$0]  %s2434_s4, 32, %s3711_s10, [#allocation3]  }
0x2238   :  { %3047 = dma.done.wait [#allocation3], 32  }
0x2239   :  { %3048 = vsyncadd [#allocation3], 4294967264 }
0x223a   :  { %2440 = vsyncpa [#allocation3], 1 }

</bundles_post_ra>
